<compile_context>
chip_gen: v7x
topology: tpu7x:2x2x1
jax: 0.10.0
libtpu: 0.0.40
codegen_flags: <defaults>
</compile_context>

<pallas_src>
import functools
import math

import numpy as np
import jax
import jax.numpy as jnp
from jax.experimental import pallas as pl
from jax.experimental.pallas import tpu as pltpu

LANE = 128
_EPS = 1e-5
_VMEM_LIMIT_BYTES = 32 * 1024 * 1024

_CompilerParams = getattr(pltpu, "CompilerParams", None) or getattr(
    pltpu, "TPUCompilerParams")

_VMEM_SPEC = pl.BlockSpec(memory_space=pltpu.MemorySpace.VMEM)
_SMEM_SPEC = pl.BlockSpec(memory_space=pltpu.MemorySpace.SMEM)


def _round_up(x, m):
    return ((x + m - 1) // m) * m


def _dropout_threshold(p):
    """uint32 threshold t such that P(bits < t) == p (drop iff bits < t)."""
    if p <= 0.0:
        return None
    return min(int(round(p * 4294967296.0)), 4294967295)


# ---------------------------------------------------------------------------
# Kernel 1: whole MLP fused in a single pallas_call (batch resident in VMEM).
# ---------------------------------------------------------------------------
def _fused_mlp_kernel(*args, num_hidden, drop_threshold, inv_keep):
    o_ref = args[-1]
    alphas_ref = args[0]          # SMEM (num_hidden,) f32
    x_ref = args[1]
    refs_per_hidden = 5 if drop_threshold is not None else 4

    h = x_ref[...]
    idx = 2
    for l in range(num_hidden):
        wt_ref, b_ref, g_ref, be_ref = args[idx:idx + 4]
        bits_ref = args[idx + 4] if drop_threshold is not None else None
        idx += refs_per_hidden

        # Linear: bf16 MXU matmul, f32 accumulate.
        y = jnp.dot(h.astype(jnp.bfloat16), wt_ref[...],
                    preferred_element_type=jnp.float32) + b_ref[...]

        # BatchNorm1d (training, biased stats) folded into one scale/shift FMA.
        inv_n = jnp.float32(1.0 / y.shape[0])
        mean = jnp.sum(y, axis=0, keepdims=True) * inv_n
        var = jnp.maximum(
            jnp.sum(y * y, axis=0, keepdims=True) * inv_n - mean * mean, 0.0)
        scale = g_ref[...] * jax.lax.rsqrt(var + _EPS)
        shift = be_ref[...] - mean * scale
        z = y * scale + shift

        # PReLU (single learnable alpha, scalar read from SMEM).
        a = alphas_ref[l]
        z = jnp.where(z >= 0.0, z, a * z)

        # Dropout: raw uint32 bits vs uint threshold, folded 1/(1-p) scale.
        if drop_threshold is not None:
            keep = bits_ref[...] >= np.uint32(drop_threshold)
            z = jnp.where(keep, z * jnp.float32(inv_keep), jnp.float32(0.0))
        h = z

    wt_ref, b_ref = args[idx], args[idx + 1]
    o_ref[...] = (jnp.dot(h.astype(jnp.bfloat16), wt_ref[...],
                          preferred_element_type=jnp.float32)
                  + b_ref[...]).astype(o_ref.dtype)


# ---------------------------------------------------------------------------
# Kernel 2: N-tiled hidden layer, grid = (phase, tile).
#   phase 0: accumulate full-batch BN sum / sum-of-squares into VMEM scratch
#   phase 1: recompute tile matmul, apply fused BN + PReLU + dropout, store
# ---------------------------------------------------------------------------
def _hidden_layer_tiled_kernel(*args, tile_n, n_valid, n_padded,
                               drop_threshold, inv_keep):
    if drop_threshold is not None:
        (alpha_ref, x_ref, wt_ref, b_ref, g_ref, be_ref, bits_ref,
         o_ref, sum_ref, sq_ref) = args
    else:
        (alpha_ref, x_ref, wt_ref, b_ref, g_ref, be_ref,
         o_ref, sum_ref, sq_ref) = args
        bits_ref = None

    ph = pl.program_id(0)
    ti = pl.program_id(1)

    @pl.when(jnp.logical_and(ph == 0, ti == 0))
    def _init():
        sum_ref[...] = jnp.zeros_like(sum_ref)
        sq_ref[...] = jnp.zeros_like(sq_ref)

    # Linear (needed in both phases; recompute beats an HBM round-trip of y).
    y = jnp.dot(x_ref[...].astype(jnp.bfloat16), wt_ref[...],
                preferred_element_type=jnp.float32) + b_ref[...]

    @pl.when(ph == 0)
    def _accumulate_stats():
        ys = y
        if n_valid != n_padded:   # static: mask zero-padded rows out of stats
            row = ti * tile_n + jax.lax.broadcasted_iota(
                jnp.int32, (tile_n, 1), 0)
            ys = jnp.where(row < n_valid, y, 0.0)
        sum_ref[...] += jnp.sum(ys, axis=0, keepdims=True)
        sq_ref[...] += jnp.sum(ys * ys, axis=0, keepdims=True)

    @pl.when(ph == 1)
    def _normalize_act_dropout():
        inv_n = jnp.float32(1.0 / n_valid)
        mean = sum_ref[...] * inv_n
        var = jnp.maximum(sq_ref[...] * inv_n - mean * mean, 0.0)
        scale = g_ref[...] * jax.lax.rsqrt(var + _EPS)
        shift = be_ref[...] - mean * scale
        z = y * scale + shift
        a = alpha_ref[0]
        z = jnp.where(z >= 0.0, z, a * z)
        if drop_threshold is not None:
            keep = bits_ref[...] >= np.uint32(drop_threshold)
            z = jnp.where(keep, z * jnp.float32(inv_keep), jnp.float32(0.0))
        o_ref[...] = z.astype(o_ref.dtype)


# ---------------------------------------------------------------------------
# Kernel 3: N-tiled final Linear.
# ---------------------------------------------------------------------------
def _linear_tiled_kernel(x_ref, wt_ref, b_ref, o_ref):
    o_ref[...] = (jnp.dot(x_ref[...].astype(jnp.bfloat16), wt_ref[...],
                          preferred_element_type=jnp.float32)
                  + b_ref[...]).astype(o_ref.dtype)


# ---------------------------------------------------------------------------
# Wrappers
# ---------------------------------------------------------------------------
def _fused_mlp_forward(prep, x, p, rng_key):
    layers = prep["layers"]
    num_hidden = len(layers) - 1
    N = x.shape[0]
    drop_threshold = _dropout_threshold(p)
    inv_keep = 1.0 / (1.0 - p) if drop_threshold is not None else 1.0
    drop_keys = (jax.random.split(rng_key, num_hidden)
                 if drop_threshold is not None else None)

    inputs = [prep["alphas"], x]
    in_specs = [_SMEM_SPEC, _VMEM_SPEC]
    for l in range(num_hidden):
        L = layers[l]
        inputs += [L["wt"], L["b"], L["gamma"], L["beta"]]
        in_specs += [_VMEM_SPEC] * 4
        if drop_threshold is not None:
            bits = jax.random.bits(drop_keys[l], (N, L["wt"].shape[1]),
                                   dtype=jnp.uint32)
            inputs.append(bits)
            in_specs.append(_VMEM_SPEC)
    last = layers[-1]
    inputs += [last["wt"], last["b"]]
    in_specs += [_VMEM_SPEC] * 2

    kernel = functools.partial(_fused_mlp_kernel, num_hidden=num_hidden,
                               drop_threshold=drop_threshold, inv_keep=inv_keep)
    return pl.pallas_call(
        kernel,
        out_shape=jax.ShapeDtypeStruct((N, last["wt"].shape[1]), jnp.float32),
        in_specs=in_specs,
        out_specs=_VMEM_SPEC,
        compiler_params=_CompilerParams(vmem_limit_bytes=_VMEM_LIMIT_BYTES),
    )(*inputs)


def _hidden_layer_tiled(x, wt, b, gamma, beta, alpha, bits, p, n_valid, tile_n):
    Np, din = x.shape
    dout = wt.shape[1]
    n_tiles = Np // tile_n
    drop_threshold = _dropout_threshold(p)
    inv_keep = 1.0 / (1.0 - p) if drop_threshold is not None else 1.0

    inputs = [alpha, x, wt, b, gamma, beta]
    in_specs = [
        _SMEM_SPEC,                                          # PReLU alpha (1,)
        pl.BlockSpec((tile_n, din), lambda ph, i: (i, 0)),   # x tile
        pl.BlockSpec((din, dout), lambda ph, i: (0, 0)),     # weights, resident
        pl.BlockSpec((1, dout), lambda ph, i: (0, 0)),       # bias
        pl.BlockSpec((1, dout), lambda ph, i: (0, 0)),       # gamma
        pl.BlockSpec((1, dout), lambda ph, i: (0, 0)),       # beta
    ]
    if drop_threshold is not None:
        inputs.append(bits)
        # Only consumed in phase 1; constant block during phase 0 avoids DMA.
        in_specs.append(pl.BlockSpec((tile_n, dout), lambda ph, i: (ph * i, 0)))

    kernel = functools.partial(
        _hidden_layer_tiled_kernel, tile_n=tile_n, n_valid=n_valid,
        n_padded=Np, drop_threshold=drop_threshold, inv_keep=inv_keep)

    return pl.pallas_call(
        kernel,
        out_shape=jax.ShapeDtypeStruct((Np, dout), jnp.float32),
        grid=(2, n_tiles),
        in_specs=in_specs,
        # Phase 0 never writes output: keep block 0 resident, write per-tile in
        # phase 1 -> every output block is visited (and written) exactly once.
        out_specs=pl.BlockSpec((tile_n, dout), lambda ph, i: (ph * i, 0)),
        scratch_shapes=[pltpu.VMEM((1, dout), jnp.float32),   # sum
                        pltpu.VMEM((1, dout), jnp.float32)],  # sum of squares
        compiler_params=_CompilerParams(
            dimension_semantics=("arbitrary", "arbitrary"),
            vmem_limit_bytes=_VMEM_LIMIT_BYTES),
    )(*inputs)


def _linear_tiled(x, wt, b, tile_n):
    Np, din = x.shape
    dout = wt.shape[1]
    n_tiles = Np // tile_n
    return pl.pallas_call(
        _linear_tiled_kernel,
        out_shape=jax.ShapeDtypeStruct((Np, dout), jnp.float32),
        grid=(n_tiles,),
        in_specs=[pl.BlockSpec((tile_n, din), lambda i: (i, 0)),
                  pl.BlockSpec((din, dout), lambda i: (0, 0)),
                  pl.BlockSpec((1, dout), lambda i: (0, 0))],
        out_specs=pl.BlockSpec((tile_n, dout), lambda i: (i, 0)),
        compiler_params=_CompilerParams(
            dimension_semantics=("parallel",),
            vmem_limit_bytes=_VMEM_LIMIT_BYTES),
    )(x, wt, b)


# ---------------------------------------------------------------------------
# Parameters: init matches MLP.reset_parameters; prepare_params builds the
# kernel-ready layout ONCE (transpose, pad lanes to 128, cast weights to bf16).
# ---------------------------------------------------------------------------
def init_mlp_params(key, in_dim, hidden, out_dim, num_layer):
    if num_layer == 1:
        layer_dims = [(in_dim, out_dim)]
    else:
        layer_dims = ([(in_dim, hidden)]
                      + [(hidden, hidden)] * (num_layer - 2)
                      + [(hidden, out_dim)])
    lins, norms, acts = [], [], []
    keys = jax.random.split(key, len(layer_dims))
    for i, (fan_in, fan_out) in enumerate(layer_dims):
        stdv = 1.0 / math.sqrt(fan_in)
        W = jax.random.uniform(keys[i], (fan_out, fan_in),
                               minval=-stdv, maxval=stdv, dtype=jnp.float32)
        b = jnp.zeros((fan_out,), jnp.float32)
        lins.append((W, b))
        if i < len(layer_dims) - 1:
            norms.append((jnp.ones((fan_out,), jnp.float32),    # gamma
                          jnp.zeros((fan_out,), jnp.float32)))  # beta
            acts.append(jnp.full((1,), 0.25, jnp.float32))      # PReLU alpha
    return {"lins": lins, "norms": norms, "acts": acts}


def prepare_params(params):
    lins, norms = params["lins"], params["norms"]
    num_layer = len(lins)
    layers = []
    prev_dout_pad = None
    for i, (W, b) in enumerate(lins):
        fan_out, fan_in = W.shape
        din = fan_in if i == 0 else prev_dout_pad
        dout = _round_up(fan_out, LANE)
        wt = jnp.zeros((din, dout), jnp.float32).at[:fan_in, :fan_out].set(W.T)
        layer = {"wt": wt.astype(jnp.bfloat16),
                 "b": jnp.zeros((1, dout), jnp.float32).at[0, :fan_out].set(b)}
        if i < num_layer - 1:
            gamma, beta = norms[i]
            layer["gamma"] = jnp.zeros((1, dout),
                                       jnp.float32).at[0, :fan_out].set(gamma)
            layer["beta"] = jnp.zeros((1, dout),
                                      jnp.float32).at[0, :fan_out].set(beta)
        layers.append(layer)
        prev_dout_pad = dout
    alphas = (jnp.concatenate([a.reshape(1) for a in params["acts"]])
              if params["acts"] else jnp.zeros((1,), jnp.float32))
    return {"layers": layers, "alphas": alphas,
            "in_dim": lins[0][0].shape[1], "out_dim": lins[-1][0].shape[0]}


def mlp_forward(prep, x, dropout_p, *, training=True, rng_key=None,
                tile_n=512, fuse_row_limit=4096):
    layers = prep["layers"]
    num_hidden = len(layers) - 1
    N, din = x.shape
    assert din == prep["in_dim"], "input feature dim mismatch"
    out_dim = prep["out_dim"]
    p = float(dropout_p) if training else 0.0
    if p > 0.0 and rng_key is None:
        rng_key = jax.random.PRNGKey(0)   # NOTE: vary per step for fresh masks

    if num_hidden > 0 and N <= fuse_row_limit:
        out = _fused_mlp_forward(prep, x, p, rng_key)
        return out[:, :out_dim]

    # Tiled path: scales to arbitrary N (e.g. ogbn-mag's ~736K nodes).
    tile = max(8, min(tile_n, _round_up(N, 8)))
    Np = _round_up(N, tile)
    h = x if Np == N else jnp.pad(x, ((0, Np - N), (0, 0)))
    drop_keys = (jax.random.split(rng_key, num_hidden)
                 if (p > 0.0 and num_hidden > 0) else None)
    for l in range(num_hidden):
        L = layers[l]
        bits = (jax.random.bits(drop_keys[l], (Np, L["wt"].shape[1]),
                                dtype=jnp.uint32) if p > 0.0 else None)
        h = _hidden_layer_tiled(h, L["wt"], L["b"], L["gamma"], L["beta"],
                                prep["alphas"][l:l + 1], bits, p, N, tile)
    last = layers[-1]
    out = _linear_tiled(h, last["wt"], last["b"], tile)
    return out[:N, :out_dim]


def mlp_reference(params, x):
    """Pure-JAX f32 reference (training-mode batch stats, dropout disabled)."""
    lins, norms, acts = params["lins"], params["norms"], params["acts"]
    num_layer = len(lins)
    h = x
    for i, (W, b) in enumerate(lins):
        h = h @ W.T + b
        if i < num_layer - 1:
            gamma, beta = norms[i]
            mean = jnp.mean(h, axis=0, keepdims=True)
            var = jnp.mean((h - mean) ** 2, axis=0, keepdims=True)
            h = gamma * (h - mean) * jax.lax.rsqrt(var + _EPS) + beta
            h = jnp.where(h >= 0.0, h, acts[i][0] * h)
    return h


# ---------------------------------------------------------------------------
if __name__ == "__main__":
    in_dim, hidden, out_dim = 32, 64, 16
    num_layer, dropout = 3, 0.5
    N = 200

    key = jax.random.PRNGKey(0)
    k_x, k_p, k_d = jax.random.split(key, 3)
    x = jax.random.normal(k_x, (N, in_dim), dtype=jnp.float32)
    params = init_mlp_params(k_p, in_dim, hidden, out_dim, num_layer)
    prep = prepare_params(params)

    # Training-mode forward (dropout active) via the fully-fused single kernel.
    out_train = jax.block_until_ready(
        mlp_forward(prep, x, dropout_p=dropout, training=True, rng_key=k_d))
    assert out_train.shape == (N, out_dim) and out_train.dtype == jnp.float32
    assert bool(jnp.all(jnp.isfinite(out_train)))

    # Deterministic check (dropout off): fused path vs N-tiled two-pass path
    # vs pure-JAX f32 reference (kernels use bf16 MXU matmuls -> loose tol).
    out_fused = jax.block_until_ready(mlp_forward(prep, x, 0.0, training=True))
    out_tiled = jax.block_until_ready(
        mlp_forward(prep, x, 0.0, training=True, tile_n=128, fuse_row_limit=0))
    ref = mlp_reference(params, x)
    assert float(jnp.max(jnp.abs(out_fused - out_tiled))) < 3e-2
    assert float(jnp.max(jnp.abs(out_fused - ref))) < 1e-1

    print("KERNEL_OK")
</pallas_src>

<mosaic_0001>
module attributes {stable_mosaic.version = 11 : i64} {
  func.func @_fused_mlp_kernel(%arg0: memref<2xf32, #tpu.memory_space<smem>>, %arg1: memref<200x32xf32, #tpu.memory_space<vmem>>, %arg2: memref<32x128xbf16, #tpu.memory_space<vmem>>, %arg3: memref<1x128xf32, #tpu.memory_space<vmem>>, %arg4: memref<1x128xf32, #tpu.memory_space<vmem>>, %arg5: memref<1x128xf32, #tpu.memory_space<vmem>>, %arg6: memref<200x128xi32, #tpu.memory_space<vmem>>, %arg7: memref<128x128xbf16, #tpu.memory_space<vmem>>, %arg8: memref<1x128xf32, #tpu.memory_space<vmem>>, %arg9: memref<1x128xf32, #tpu.memory_space<vmem>>, %arg10: memref<1x128xf32, #tpu.memory_space<vmem>>, %arg11: memref<200x128xi32, #tpu.memory_space<vmem>>, %arg12: memref<128x128xbf16, #tpu.memory_space<vmem>>, %arg13: memref<1x128xf32, #tpu.memory_space<vmem>>, %arg14: memref<200x128xf32, #tpu.memory_space<vmem>>) attributes {dimension_semantics = [], scalar_prefetch = 0 : i64, scratch_operands = 0 : i64, tpu.core_type = #tpu.core_type<tc>} {
    %c0 = arith.constant 0 : index
    %c0_0 = arith.constant 0 : index
    %0 = vector.load %arg1[%c0, %c0_0] : memref<200x32xf32, #tpu.memory_space<vmem>>, vector<200x32xf32>
    %1 = arith.truncf %0 : vector<200x32xf32> to vector<200x32xbf16>
    %c0_1 = arith.constant 0 : index
    %c0_2 = arith.constant 0 : index
    %2 = vector.load %arg2[%c0_1, %c0_2] : memref<32x128xbf16, #tpu.memory_space<vmem>>, vector<32x128xbf16>
    %cst = arith.constant dense<0.000000e+00> : vector<200x128xf32>
    %3 = tpu.matmul %1, %2, %cst {dimension_numbers = #tpu.dot_dimension_numbers<[1], [0], [0], [1], [0, 0, 1, 1], [], []>} : vector<200x32xbf16>, vector<32x128xbf16>, vector<200x128xf32> -> vector<200x128xf32>
    %c0_3 = arith.constant 0 : index
    %c0_4 = arith.constant 0 : index
    %4 = vector.load %arg3[%c0_3, %c0_4] : memref<1x128xf32, #tpu.memory_space<vmem>>, vector<1x128xf32>
    %5 = vector.broadcast %4 : vector<1x128xf32> to vector<200x128xf32>
    %6 = arith.addf %3, %5 : vector<200x128xf32>
    %cst_5 = arith.constant dense<0.000000e+00> : vector<128xf32>
    %7 = vector.multi_reduction <add>, %6, %cst_5 [0] : vector<200x128xf32> to vector<128xf32>
    %8 = vector.shape_cast %7 : vector<128xf32> to vector<1x128xf32>
    %cst_6 = arith.constant 5.000000e-03 : f32
    %9 = vector.broadcast %cst_6 : f32 to vector<1x128xf32>
    %10 = arith.mulf %8, %9 : vector<1x128xf32>
    %11 = arith.mulf %6, %6 : vector<200x128xf32>
    %cst_7 = arith.constant dense<0.000000e+00> : vector<128xf32>
    %12 = vector.multi_reduction <add>, %11, %cst_7 [0] : vector<200x128xf32> to vector<128xf32>
    %13 = vector.shape_cast %12 : vector<128xf32> to vector<1x128xf32>
    %cst_8 = arith.constant 5.000000e-03 : f32
    %14 = vector.broadcast %cst_8 : f32 to vector<1x128xf32>
    %15 = arith.mulf %13, %14 : vector<1x128xf32>
    %16 = arith.mulf %10, %10 : vector<1x128xf32>
    %17 = arith.subf %15, %16 : vector<1x128xf32>
    %cst_9 = arith.constant 0.000000e+00 : f32
    %18 = vector.broadcast %cst_9 : f32 to vector<1x128xf32>
    %19 = arith.maximumf %17, %18 : vector<1x128xf32>
    %c0_10 = arith.constant 0 : index
    %c0_11 = arith.constant 0 : index
    %20 = vector.load %arg4[%c0_10, %c0_11] : memref<1x128xf32, #tpu.memory_space<vmem>>, vector<1x128xf32>
    %cst_12 = arith.constant 9.99999974E-6 : f32
    %21 = vector.broadcast %cst_12 : f32 to vector<1x128xf32>
    %22 = arith.addf %19, %21 : vector<1x128xf32>
    %23 = math.rsqrt %22 : vector<1x128xf32>
    %24 = arith.mulf %20, %23 : vector<1x128xf32>
    %c0_13 = arith.constant 0 : index
    %c0_14 = arith.constant 0 : index
    %25 = vector.load %arg5[%c0_13, %c0_14] : memref<1x128xf32, #tpu.memory_space<vmem>>, vector<1x128xf32>
    %26 = arith.mulf %10, %24 : vector<1x128xf32>
    %27 = arith.subf %25, %26 : vector<1x128xf32>
    %28 = vector.broadcast %24 : vector<1x128xf32> to vector<200x128xf32>
    %29 = arith.mulf %6, %28 : vector<200x128xf32>
    %30 = vector.broadcast %27 : vector<1x128xf32> to vector<200x128xf32>
    %31 = arith.addf %29, %30 : vector<200x128xf32>
    %c0_15 = arith.constant 0 : index
    %32 = memref.load %arg0[%c0_15] : memref<2xf32, #tpu.memory_space<smem>>
    %cst_16 = arith.constant 0.000000e+00 : f32
    %33 = vector.broadcast %cst_16 : f32 to vector<200x128xf32>
    %34 = arith.cmpf oge, %31, %33 : vector<200x128xf32>
    %35 = vector.broadcast %32 : f32 to vector<200x128xf32>
    %36 = arith.mulf %35, %31 : vector<200x128xf32>
    %37 = arith.select %34, %31, %36 : vector<200x128xi1>, vector<200x128xf32>
    %c0_17 = arith.constant 0 : index
    %c0_18 = arith.constant 0 : index
    %38 = vector.load %arg6[%c0_17, %c0_18] : memref<200x128xi32, #tpu.memory_space<vmem>>, vector<200x128xi32>
    %c-2147483648_i32 = arith.constant -2147483648 : i32
    %39 = vector.broadcast %c-2147483648_i32 : i32 to vector<200x128xi32>
    %40 = arith.cmpi uge, %38, %39 : vector<200x128xi32>
    %cst_19 = arith.constant 2.000000e+00 : f32
    %41 = vector.broadcast %cst_19 : f32 to vector<200x128xf32>
    %42 = arith.mulf %37, %41 : vector<200x128xf32>
    %cst_20 = arith.constant 0.000000e+00 : f32
    %43 = vector.broadcast %cst_20 : f32 to vector<200x128xf32>
    %44 = arith.select %40, %42, %43 : vector<200x128xi1>, vector<200x128xf32>
    %45 = arith.truncf %44 : vector<200x128xf32> to vector<200x128xbf16>
    %c0_21 = arith.constant 0 : index
    %c0_22 = arith.constant 0 : index
    %46 = vector.load %arg7[%c0_21, %c0_22] : memref<128x128xbf16, #tpu.memory_space<vmem>>, vector<128x128xbf16>
    %cst_23 = arith.constant dense<0.000000e+00> : vector<200x128xf32>
    %47 = tpu.matmul %45, %46, %cst_23 {dimension_numbers = #tpu.dot_dimension_numbers<[1], [0], [0], [1], [0, 0, 1, 1], [], []>} : vector<200x128xbf16>, vector<128x128xbf16>, vector<200x128xf32> -> vector<200x128xf32>
    %c0_24 = arith.constant 0 : index
    %c0_25 = arith.constant 0 : index
    %48 = vector.load %arg8[%c0_24, %c0_25] : memref<1x128xf32, #tpu.memory_space<vmem>>, vector<1x128xf32>
    %49 = vector.broadcast %48 : vector<1x128xf32> to vector<200x128xf32>
    %50 = arith.addf %47, %49 : vector<200x128xf32>
    %cst_26 = arith.constant dense<0.000000e+00> : vector<128xf32>
    %51 = vector.multi_reduction <add>, %50, %cst_26 [0] : vector<200x128xf32> to vector<128xf32>
    %52 = vector.shape_cast %51 : vector<128xf32> to vector<1x128xf32>
    %cst_27 = arith.constant 5.000000e-03 : f32
    %53 = vector.broadcast %cst_27 : f32 to vector<1x128xf32>
    %54 = arith.mulf %52, %53 : vector<1x128xf32>
    %55 = arith.mulf %50, %50 : vector<200x128xf32>
    %cst_28 = arith.constant dense<0.000000e+00> : vector<128xf32>
    %56 = vector.multi_reduction <add>, %55, %cst_28 [0] : vector<200x128xf32> to vector<128xf32>
    %57 = vector.shape_cast %56 : vector<128xf32> to vector<1x128xf32>
    %cst_29 = arith.constant 5.000000e-03 : f32
    %58 = vector.broadcast %cst_29 : f32 to vector<1x128xf32>
    %59 = arith.mulf %57, %58 : vector<1x128xf32>
    %60 = arith.mulf %54, %54 : vector<1x128xf32>
    %61 = arith.subf %59, %60 : vector<1x128xf32>
    %cst_30 = arith.constant 0.000000e+00 : f32
    %62 = vector.broadcast %cst_30 : f32 to vector<1x128xf32>
    %63 = arith.maximumf %61, %62 : vector<1x128xf32>
    %c0_31 = arith.constant 0 : index
    %c0_32 = arith.constant 0 : index
    %64 = vector.load %arg9[%c0_31, %c0_32] : memref<1x128xf32, #tpu.memory_space<vmem>>, vector<1x128xf32>
    %cst_33 = arith.constant 9.99999974E-6 : f32
    %65 = vector.broadcast %cst_33 : f32 to vector<1x128xf32>
    %66 = arith.addf %63, %65 : vector<1x128xf32>
    %67 = math.rsqrt %66 : vector<1x128xf32>
    %68 = arith.mulf %64, %67 : vector<1x128xf32>
    %c0_34 = arith.constant 0 : index
    %c0_35 = arith.constant 0 : index
    %69 = vector.load %arg10[%c0_34, %c0_35] : memref<1x128xf32, #tpu.memory_space<vmem>>, vector<1x128xf32>
    %70 = arith.mulf %54, %68 : vector<1x128xf32>
    %71 = arith.subf %69, %70 : vector<1x128xf32>
    %72 = vector.broadcast %68 : vector<1x128xf32> to vector<200x128xf32>
    %73 = arith.mulf %50, %72 : vector<200x128xf32>
    %74 = vector.broadcast %71 : vector<1x128xf32> to vector<200x128xf32>
    %75 = arith.addf %73, %74 : vector<200x128xf32>
    %c1 = arith.constant 1 : index
    %76 = memref.load %arg0[%c1] : memref<2xf32, #tpu.memory_space<smem>>
    %cst_36 = arith.constant 0.000000e+00 : f32
    %77 = vector.broadcast %cst_36 : f32 to vector<200x128xf32>
    %78 = arith.cmpf oge, %75, %77 : vector<200x128xf32>
    %79 = vector.broadcast %76 : f32 to vector<200x128xf32>
    %80 = arith.mulf %79, %75 : vector<200x128xf32>
    %81 = arith.select %78, %75, %80 : vector<200x128xi1>, vector<200x128xf32>
    %c0_37 = arith.constant 0 : index
    %c0_38 = arith.constant 0 : index
    %82 = vector.load %arg11[%c0_37, %c0_38] : memref<200x128xi32, #tpu.memory_space<vmem>>, vector<200x128xi32>
    %c-2147483648_i32_39 = arith.constant -2147483648 : i32
    %83 = vector.broadcast %c-2147483648_i32_39 : i32 to vector<200x128xi32>
    %84 = arith.cmpi uge, %82, %83 : vector<200x128xi32>
    %cst_40 = arith.constant 2.000000e+00 : f32
    %85 = vector.broadcast %cst_40 : f32 to vector<200x128xf32>
    %86 = arith.mulf %81, %85 : vector<200x128xf32>
    %cst_41 = arith.constant 0.000000e+00 : f32
    %87 = vector.broadcast %cst_41 : f32 to vector<200x128xf32>
    %88 = arith.select %84, %86, %87 : vector<200x128xi1>, vector<200x128xf32>
    %89 = arith.truncf %88 : vector<200x128xf32> to vector<200x128xbf16>
    %c0_42 = arith.constant 0 : index
    %c0_43 = arith.constant 0 : index
    %90 = vector.load %arg12[%c0_42, %c0_43] : memref<128x128xbf16, #tpu.memory_space<vmem>>, vector<128x128xbf16>
    %cst_44 = arith.constant dense<0.000000e+00> : vector<200x128xf32>
    %91 = tpu.matmul %89, %90, %cst_44 {dimension_numbers = #tpu.dot_dimension_numbers<[1], [0], [0], [1], [0, 0, 1, 1], [], []>} : vector<200x128xbf16>, vector<128x128xbf16>, vector<200x128xf32> -> vector<200x128xf32>
    %c0_45 = arith.constant 0 : index
    %c0_46 = arith.constant 0 : index
    %92 = vector.load %arg13[%c0_45, %c0_46] : memref<1x128xf32, #tpu.memory_space<vmem>>, vector<1x128xf32>
    %93 = vector.broadcast %92 : vector<1x128xf32> to vector<200x128xf32>
    %94 = arith.addf %91, %93 : vector<200x128xf32>
    %c0_47 = arith.constant 0 : index
    %c0_48 = arith.constant 0 : index
    %95 = vector.load %arg14[%c0_47, %c0_48] : memref<200x128xf32, #tpu.memory_space<vmem>>, vector<200x128xf32>
    tpu.vector_store %arg14[%c0_47, %c0_48], %94 {strides = array<i32>} : memref<200x128xf32, #tpu.memory_space<vmem>>, vector<200x128xf32>,
    return
  }
}

</mosaic_0001>

<bundles_post_ra>
// kernel: tpu_custom_call.1
= control target key start
LH: loop header
LB: loop body
LE: loop exit
PB: predicated region body
PF: predicated region fallthrough
CT: control target
= control target key end

     0   :  { %19 = vsyncpa [#allocation5], 0  ;;  %s3120_s0 = inlined_call_operand.vmem [shape: f32[2], index: 0, kind: input, shape index: {}]   ;;  %s3121_s1 = inlined_call_operand.vmem [shape: f32[200,32], index: 1, kind: input, shape index: {}]   ;;  %s3122_s2 = inlined_call_operand.vmem [shape: bf16[32,128], index: 2, kind: input, shape index: {}]   ;;  %s3123_s3 = inlined_call_operand.vmem [shape: f32[1,128], index: 3, kind: input, shape index: {}]   ;;  %s3124_s4 = inlined_call_operand.vmem [shape: f32[1,128], index: 4, kind: input, shape index: {}]   ;;  %s3125_s5 = inlined_call_operand.vmem [shape: f32[1,128], index: 5, kind: input, shape index: {}]   ;;  %s3126_s6 = inlined_call_operand.vmem [shape: u32[200,128], index: 6, kind: input, shape index: {}]   ;;  %s3127_s7 = inlined_call_operand.vmem [shape: bf16[128,128], index: 7, kind: input, shape index: {}]   ;;  %s3128_s8 = inlined_call_operand.vmem [shape: f32[1,128], index: 8, kind: input, shape index: {}]   ;;  %s3129_s9 = inlined_call_operand.vmem [shape: f32[1,128], index: 9, kind: input, shape index: {}]   ;;  %s3130_s10 = inlined_call_operand.vmem [shape: f32[1,128], index: 10, kind: input, shape index: {}]   ;;  %s3131_s11 = inlined_call_operand.hbm [shape: u32[200,128], index: 11, kind: input, shape index: {}]   ;;  %s3132_s12 = inlined_call_operand.hbm [shape: bf16[128,128], index: 12, kind: input, shape index: {}]   ;;  %s3133_s13 = inlined_call_operand.vmem [shape: f32[1,128], index: 13, kind: input, shape index: {}]   ;;  %s3134_s14 = inlined_call_operand.hbm [shape: f32[200,128], index: 14, kind: output, shape index: {}]  }
   0x1   :  { %20 = vsyncpa [#allocation3], 0 }
   0x2   :  { %21 = vsyncpa [#allocation8], 0 }
   0x3   :  { %22 = vsyncpa [#allocation4], 0  ;;  %s29_s15 = sshll.u32 %s3120_s0, 4  ;;  %s30_s15 = int_to_ptr.vmem [resolvable:$true] %s29_s15 }
   0x4   :  { %s1881_s16 = scalar_lea.vmem %s30_s15, 16  ;;  %p1886_p1 = scmp.lt.s32.totalorder %s30_s15, %s30_s15 }
   0x5   :  { %p1882_p0 = scmp.ne.s32.totalorder %s30_s15, %s1881_s16  ;;  %p1887_p2 = scmp.lt.s32.totalorder %s1881_s16, %s1881_s16 }
   0x7   :  { %p1888_p3 = por %p1887_p2, %p1886_p1 }
   0x9   :  { %p1889_p4 = pnand %p1888_p3, %p1882_p0 }
   0xb   :  { %1892 = shalt.err (!%p1889_p4)
}
   0xc   :  { %s1967_s17 = smov [#allocation2]   ;;  %s1968_s18 = smov [#allocation6]  }
   0xd   :  { %32 = dma.vmem_to_smem %s30_s15, 16, %s1967_s17, [#allocation5]  }
   0xe   :  { %s58_s19 = sshll.u32 %s1968_s18, 4  ;;  %s1893_s22 = scalar_lea.hbm %s3131_s11, 3200  ;;  %s59_s19 = int_to_ptr.vmem [resolvable:$true] %s58_s19 }
   0xf   :  { %p1894_p5 = scmp.ne.s32.totalorder %s3131_s11, %s1893_s22  ;;  %p1897_p6 = scmp.lt.u32.totalorder %s1893_s22, %s3131_s11 }
  0x11   :  { %p1899_p7 = pnand %p1897_p6, %p1894_p5 }
  0x13   :  { %1902 = shalt.err (!%p1899_p7)
}
  0x14   :  { %s1903_s26 = scalar_lea.vmem %s59_s19, 3200  ;;  %p1908_p9 = scmp.lt.s32.totalorder %s59_s19, %s59_s19 }
  0x15   :  { %p1904_p8 = scmp.ne.s32.totalorder %s59_s19, %s1903_s26  ;;  %p1909_p10 = scmp.lt.s32.totalorder %s1903_s26, %s1903_s26 }
  0x17   :  { %p1910_p11 = por %p1909_p10, %p1908_p9 }
  0x19   :  { %p1911_p12 = pnand %p1910_p11, %p1904_p8 }
  0x1b   :  { %1914 = shalt.err (!%p1911_p12)
}
  0x1c   :  { %s1969_s27 = smov 128   ;;  %s1970_s28 = smov 8  }
  0x1d   :  { %64 = dma.hbm_to_vmem [thread:$0]  %s3131_s11, 3200, %s59_s19, [#allocation3], %s1969_s27, %s1969_s27, %s1970_s28  }
  0x1e   :  { %s1971_s15 = smov [#allocation7]   ;;  %s1915_s20 = scalar_lea.hbm %s3132_s12, 1024 }
  0x1f   :  { %s70_s16 = sshll.u32 %s1971_s15, 4  ;;  %p1916_p13 = scmp.ne.s32.totalorder %s3132_s12, %s1915_s20  ;;  %s71_s16 = int_to_ptr.vmem [resolvable:$true] %s70_s16 }
  0x20   :  { %p1919_p0 = scmp.lt.u32.totalorder %s1915_s20, %s3132_s12 }
  0x22   :  { %p1921_p1 = pnand %p1919_p0, %p1916_p13 }
  0x24   :  { %1924 = shalt.err (!%p1921_p1)
}
  0x25   :  { %s1925_s0 = scalar_lea.vmem %s71_s16, 1024  ;;  %p1930_p3 = scmp.lt.s32.totalorder %s71_s16, %s71_s16 }
  0x26   :  { %p1926_p2 = scmp.ne.s32.totalorder %s71_s16, %s1925_s0  ;;  %p1931_p4 = scmp.lt.s32.totalorder %s1925_s0, %s1925_s0 }
  0x28   :  { %p1932_p5 = por %p1931_p4, %p1930_p3 }
  0x2a   :  { %p1933_p6 = pnand %p1932_p5, %p1926_p2 }
  0x2c   :  { %1936 = shalt.err (!%p1933_p6)
}
  0x2d   :  { %s1972_s11 = smov 64   ;;  %s1973_s19 = smov 4  }
  0x2e   :  { %76 = dma.hbm_to_vmem [thread:$0]  %s3132_s12, 1024, %s71_s16, [#allocation8], %s1972_s11, %s1972_s11, %s1973_s19  }
  0x2f   :  { %1959 = dma.done.wait [#allocation5], 16  }
  0x30   :  { %1960 = vsyncadd [#allocation5], 4294967280 }
  0x31   :  { %1961 = dma.done.wait [#allocation3], 3200  }
  0x32   :  { %1962 = vsyncadd [#allocation3], 4294964096 }
  0x33   :  { %1963 = dma.done.wait [#allocation8], 1024  }
  0x34   :  { %1964 = vsyncadd [#allocation8], 4294966272 }
  0x35   :  { %88 = sfence }
  0x36   :  { %v1859_v0 = vld [vmem:[%s3122_s2] sm:$0xff]   ;;  %v1974_v1 = vmov 0.0   ;;  %v1860_v2 = vld [vmem:[%s3122_s2 + $0x8] sm:$0xff]   ;;  %vm1975_vm0 = vmmov 0   ;;  %v104_v5 = vld [vmem:[%s3121_s1 + $0x70] sm:$0xff]  ;;  %vm151_vm1 = vcmask 261120  }
  0x37   :  { %1653 = vmatprep.subr.bf16.mxu0 %v1974_v1  ;;  %1845 = vmatprep.subr.bf16.mxu1 %v1974_v1  ;;  %v90_v3 = vld [vmem:[%s3121_s1] sm:$0xff]  ;;  %v91_v4 = vld [vmem:[%s3121_s1 + $0x8] sm:$0xff]  ;;  %v105_v7 = vld [vmem:[%s3121_s1 + $0x78] sm:$0xff]  ;;  %s486_s26 = sld [smem:[#allocation2]]  ;;  %s1547_s16 = sld [smem:[#allocation2 + $0x1]] }
  0x38   :  { %1654 = vmatpush3.bf16.msra.mxu0 %v1859_v0  ;;  %1657 = vmatprep.mubr.msk.bf16.mxu0 %vm1975_vm0, %v1974_v1  ;;  %v115_v6 = vpack.c.bf16 %v91_v4, %v90_v3  ;;  %v122_v8 = vpack.c.bf16 %v105_v7, %v104_v5  ;;  %v92_v9 = vld [vmem:[%s3121_s1 + $0x10] sm:$0xff]  ;;  %v93_v10 = vld [vmem:[%s3121_s1 + $0x18] sm:$0xff]  ;;  %v106_v11 = vld [vmem:[%s3121_s1 + $0x80] sm:$0xff] }
  0x39   :  { %1655 = vmatprep.subr.bf16.mxu0 %v1974_v1  ;;  %1847 = vmatpush3.bf16.msra.mxu1 %v1859_v0  ;;  %v107_v12 = vld [vmem:[%s3121_s1 + $0x88] sm:$0xff]  ;;  %v116_v13 = vpack.c.bf16 %v93_v10, %v92_v9  ;;  %v94_v15 = vld [vmem:[%s3121_s1 + $0x20] sm:$0xff]  ;;  %v108_v17 = vld [vmem:[%s3121_s1 + $0x90] sm:$0xff] }
  0x3a   :  { %1846 = vmatprep.subr.bf16.mxu1 %v1974_v1  ;;  %1685 = vmatprep.mubr.msk.bf16.mxu1 %vm1975_vm0, %v1974_v1  ;;  %v123_v14 = vpack.c.bf16 %v107_v12, %v106_v11  ;;  %v95_v16 = vld [vmem:[%s3121_s1 + $0x28] sm:$0xff]  ;;  %v109_v18 = vld [vmem:[%s3121_s1 + $0x98] sm:$0xff]  ;;  %v96_v21 = vld [vmem:[%s3121_s1 + $0x30] sm:$0xff] }
  0x3b   :  { %v117_v19 = vpack.c.bf16 %v95_v16, %v94_v15  ;;  %v124_v20 = vpack.c.bf16 %v109_v18, %v108_v17  ;;  %v97_v22 = vld [vmem:[%s3121_s1 + $0x38] sm:$0xff]  ;;  %v110_v23 = vld [vmem:[%s3121_s1 + $0xa0] sm:$0xff]  ;;  %v111_v24 = vld [vmem:[%s3121_s1 + $0xa8] sm:$0xff] }
  0x3c   :  { %1656 = vmatpush3.bf16.msra.mxu0 %v1860_v2  ;;  %v118_v25 = vpack.c.bf16 %v97_v22, %v96_v21  ;;  %v125_v26 = vpack.c.bf16 %v111_v24, %v110_v23  ;;  %v98_v27 = vld [vmem:[%s3121_s1 + $0x40] sm:$0xff]  ;;  %v99_v28 = vld [vmem:[%s3121_s1 + $0x48] sm:$0xff]  ;;  %v112_v29 = vld [vmem:[%s3121_s1 + $0xb0] sm:$0xff] }
  0x3d   :  { %1848 = vmatpush3.bf16.msra.mxu1 %v1860_v2  ;;  %1777 = vmatprep.subr.bf16.mxu0 %v1974_v1  ;;  %v113_v30 = vld [vmem:[%s3121_s1 + $0xb8] sm:$0xff]  ;;  %v119_v31 = vpack.c.bf16 %v99_v28, %v98_v27  ;;  %v100_v33 = vld [vmem:[%s3121_s1 + $0x50] sm:$0xff]  ;;  %v114_v35 = vld [vmem:[%s3121_s1 + $0xc0] sm:$0xff] }
  0x3e   :  { %1709 = vmatprep.subr.bf16.mxu1 %v1974_v1  ;;  %v126_v32 = vpack.c.bf16 %v113_v30, %v112_v29  ;;  %v101_v34 = vld [vmem:[%s3121_s1 + $0x58] sm:$0xff]  ;;  %v127_v37 = vpack.c.bf16 %v114_v35, %v114_v35  ;;  %v102_v38 = vld [vmem:[%s3121_s1 + $0x60] sm:$0xff]  ;;  %v103_v39 = vld [vmem:[%s3121_s1 + $0x68] sm:$0xff] }
  0x3f   :  { %1658 = vmatmul.mubr.msk.bf16.vlgmr.msra.gmra.mrb[0].mxu0 %vm151_vm1, %v115_v6  ;;  %v120_v36 = vpack.c.bf16 %v101_v34, %v100_v33  ;;  %v121_v40 = vpack.c.bf16 %v103_v39, %v102_v38  ;;  %v1861_v41 = vld [vmem:[%s3127_s7] sm:$0xff]   ;;  %v1862_v42 = vld [vmem:[%s3127_s7 + $0x8] sm:$0xff]   ;;  %v1863_v43 = vld [vmem:[%s3127_s7 + $0x10] sm:$0xff]  }
  0x40   :  { %1661 = vmatprep.mubr.msk.bf16.mxu0 %vm1975_vm0, %v1974_v1  ;;  %1686 = vmatmul.mubr.msk.bf16.vlgmr.msra.gmra.mrb[0].mxu1 %vm151_vm1, %v122_v8  ;;  %v1864_v44 = vld [vmem:[%s3127_s7 + $0x18] sm:$0xff]   ;;  %v1865_v45 = vld [vmem:[%s3127_s7 + $0x20] sm:$0xff]   ;;  %v1866_v46 = vld [vmem:[%s3127_s7 + $0x28] sm:$0xff]  }
  0x41   :  { %1689 = vmatprep.mubr.msk.bf16.mxu1 %vm1975_vm0, %v1974_v1  ;;  %1710 = vmatpush3.bf16.msra.mxu1 %v1861_v41  ;;  %v1867_v47 = vld [vmem:[%s3127_s7 + $0x30] sm:$0xff]   ;;  %v1868_v48 = vld [vmem:[%s3127_s7 + $0x38] sm:$0xff]   ;;  %v2254_v0 = vld [vmem:[%s3123_s3] ss:$0 sm:$0xff] }
  0x42   :  { %1711 = vmatprep.subr.bf16.mxu1 %v1974_v1 }
  0x45   :  { %1712 = vmatpush3.bf16.msra.mxu1 %v1862_v42 }
  0x46   :  { %1713 = vmatprep.subr.bf16.mxu1 %v1974_v1 }
  0x47   :  { %1662 = vmatmul.mubr.msk.bf16.gmra.mrb[4].mxu0 %vm151_vm1, %v116_v13 }
  0x48   :  { %1665 = vmatprep.mubr.msk.bf16.mxu0 %vm1975_vm0, %v1974_v1  ;;  %1690 = vmatmul.mubr.msk.bf16.gmra.mrb[4].mxu1 %vm151_vm1, %v123_v14 }
  0x49   :  { %1693 = vmatprep.mubr.msk.bf16.mxu1 %vm1975_vm0, %v1974_v1  ;;  %1714 = vmatpush3.bf16.msra.mxu1 %v1863_v43 }
  0x4a   :  { %1715 = vmatprep.subr.bf16.mxu1 %v1974_v1 }
  0x4d   :  { %1716 = vmatpush3.bf16.msra.mxu1 %v1864_v44 }
  0x4e   :  { %1717 = vmatprep.subr.bf16.mxu1 %v1974_v1 }
  0x4f   :  { %1666 = vmatmul.mubr.msk.bf16.gmra.mrb[8].mxu0 %vm151_vm1, %v117_v19 }
  0x50   :  { %1669 = vmatprep.mubr.msk.bf16.mxu0 %vm1975_vm0, %v1974_v1  ;;  %1694 = vmatmul.mubr.msk.bf16.gmra.mrb[8].mxu1 %vm151_vm1, %v124_v20 }
  0x51   :  { %1697 = vmatprep.mubr.msk.bf16.mxu1 %vm1975_vm0, %v1974_v1  ;;  %1718 = vmatpush3.bf16.msra.mxu1 %v1865_v45 }
  0x52   :  { %1719 = vmatprep.subr.bf16.mxu1 %v1974_v1 }
  0x55   :  { %1720 = vmatpush3.bf16.msra.mxu1 %v1866_v46 }
  0x56   :  { %1721 = vmatprep.subr.bf16.mxu1 %v1974_v1 }
  0x57   :  { %1670 = vmatmul.mubr.msk.bf16.gmra.mrb[12].mxu0 %vm151_vm1, %v118_v25 }
  0x58   :  { %1673 = vmatprep.mubr.msk.bf16.mxu0 %vm1975_vm0, %v1974_v1  ;;  %1698 = vmatmul.mubr.msk.bf16.gmra.mrb[12].mxu1 %vm151_vm1, %v125_v26 }
  0x59   :  { %1701 = vmatprep.mubr.msk.bf16.mxu1 %vm1975_vm0, %v1974_v1  ;;  %1722 = vmatpush3.bf16.msra.mxu1 %v1867_v47 }
  0x5a   :  { %1723 = vmatprep.subr.bf16.mxu1 %v1974_v1 }
  0x5d   :  { %1724 = vmatpush3.bf16.msra.mxu1 %v1868_v48 }
  0x5f   :  { %1674 = vmatmul.mubr.msk.bf16.gmra.mrb[16].mxu0 %vm151_vm1, %v119_v31 }
  0x60   :  { %1677 = vmatprep.mubr.msk.bf16.mxu0 %vm1975_vm0, %v1974_v1  ;;  %1702 = vmatmul.mubr.msk.bf16.gmra.mrb[16].mxu1 %vm151_vm1, %v126_v32 }
  0x61   :  { %1705 = vmatprep.mubr.msk.bf16.mxu1 %vm1975_vm0, %v1974_v1 }
  0x67   :  { %1678 = vmatmul.mubr.msk.bf16.gmra.mrb[20].mxu0 %vm151_vm1, %v120_v36 }
  0x68   :  { %1681 = vmatprep.mubr.msk.bf16.mxu0 %vm1975_vm0, %v1974_v1  ;;  %1706 = vmatmul.mubr.msk.bf16.gmra.mrb[20].mxu1 %vm151_vm1, %v127_v37 }
  0x69   :  { %1725 = vmatprep.mubr.msk.bf16.mxu1 %vm1975_vm0, %v1974_v1 }
  0x6f   :  { %1682 = vmatmul.mubr.msk.bf16.gmra.mrb[24].mxu0 %vm151_vm1, %v121_v40 }
  0x70   :  { %1793 = vmatprep.mubr.msk.bf16.mxu0 %vm1975_vm0, %v1974_v1 }
 0x112   :  { %v225_v49 = vpop.f32.mrb[0].mxu0 }
 0x113   :  { %v1659_v50 = vpop.f32.mrb[1].mxu0  ;;  %v2243_v51 = vpop.f32.mrb[0].mxu1  ;;  %v2260_v4 = vadd.f32 %v2254_v0, %v225_v49 }
 0x114   :  { %v228_v52 = vpop.f32.mrb[2].mxu0  ;;  %v1687_v53 = vpop.f32.mrb[1].mxu1 }
 0x115   :  { %v1660_v54 = vpop.f32.mrb[3].mxu0  ;;  %v2245_v55 = vpop.f32.mrb[2].mxu1  ;;  %v2257_v3 = vadd.f32 %v2254_v0, %v228_v52  ;;  %v358_v12 = vmul.f32 %v2260_v4, %v2260_v4 }
 0x116   :  { %v1688_v56 = vpop.f32.mrb[3].mxu1 }
 0x117   :  { %v359_v7 = vmul.f32 %v2257_v3, %v2257_v3  ;;  %v327_v13 = vadd.f32 %v2257_v3, %v2260_v4 }
 0x119   :  { %v383_v19 = vadd.f32 %v359_v7, %v358_v12 }
 0x11a   :  { %v233_v57 = vpop.f32.mrb[4].mxu0 }
 0x11b   :  { %v1663_v58 = vpop.f32.mrb[5].mxu0  ;;  %v2247_v59 = vpop.f32.mrb[4].mxu1  ;;  %v2263_v5 = vadd.f32 %v2254_v0, %v233_v57 }
 0x11c   :  { %v236_v60 = vpop.f32.mrb[6].mxu0  ;;  %v1691_v61 = vpop.f32.mrb[5].mxu1 }
 0x11d   :  { %v1664_v62 = vpop.f32.mrb[7].mxu0  ;;  %v2249_v63 = vpop.f32.mrb[6].mxu1  ;;  %v360_v14 = vmul.f32 %v2263_v5, %v2263_v5  ;;  %v2276_v15 = vadd.f32 %v2254_v0, %v236_v60  ;;  %v328_v20 = vadd.f32 %v327_v13, %v2263_v5 }
 0x11e   :  { %v1692_v2 = vpop.f32.mrb[7].mxu1 }
 0x11f   :  { %v384_v22 = vadd.f32 %v383_v19, %v360_v14  ;;  %v361_v23 = vmul.f32 %v2276_v15, %v2276_v15  ;;  %v329_v25 = vadd.f32 %v328_v20, %v2276_v15 }
 0x121   :  { %v385_v32 = vadd.f32 %v384_v22, %v361_v23 }
 0x122   :  { %v241_v6 = vpop.f32.mrb[8].mxu0 }
 0x123   :  { %v1667_v8 = vpop.f32.mrb[9].mxu0  ;;  %v2267_v9 = vpop.f32.mrb[8].mxu1  ;;  %v2282_v21 = vadd.f32 %v2254_v0, %v241_v6 }
 0x124   :  { %v244_v10 = vpop.f32.mrb[10].mxu0  ;;  %v1695_v11 = vpop.f32.mrb[9].mxu1 }
 0x125   :  { %v1668_v16 = vpop.f32.mrb[11].mxu0  ;;  %v2278_v17 = vpop.f32.mrb[10].mxu1  ;;  %v362_v26 = vmul.f32 %v2282_v21, %v2282_v21  ;;  %v2290_v27 = vadd.f32 %v2254_v0, %v244_v10  ;;  %v330_v33 = vadd.f32 %v329_v25, %v2282_v21 }
 0x126   :  { %v1696_v18 = vpop.f32.mrb[11].mxu1 }
 0x127   :  { %v386_v38 = vadd.f32 %v385_v32, %v362_v26  ;;  %v363_v39 = vmul.f32 %v2290_v27, %v2290_v27  ;;  %v331_v40 = vadd.f32 %v330_v33, %v2290_v27 }
 0x129   :  { %v387_v44 = vadd.f32 %v386_v38, %v363_v39 }
 0x12a   :  { %v249_v24 = vpop.f32.mrb[12].mxu0 }
 0x12b   :  { %v1671_v28 = vpop.f32.mrb[13].mxu0  ;;  %v2292_v29 = vpop.f32.mrb[12].mxu1  ;;  %v2296_v34 = vadd.f32 %v2254_v0, %v249_v24 }
 0x12c   :  { %v252_v30 = vpop.f32.mrb[14].mxu0  ;;  %v1699_v31 = vpop.f32.mrb[13].mxu1 }
 0x12d   :  { %v1672_v35 = vpop.f32.mrb[15].mxu0  ;;  %v2298_v36 = vpop.f32.mrb[14].mxu1  ;;  %v364_v41 = vmul.f32 %v2296_v34, %v2296_v34  ;;  %v2306_v42 = vadd.f32 %v2254_v0, %v252_v30  ;;  %v332_v45 = vadd.f32 %v331_v40, %v2296_v34 }
 0x12e   :  { %v1700_v37 = vpop.f32.mrb[15].mxu1  ;;  %v2345_v35 = vadd.f32 %v2254_v0, %v2243_v51 }
 0x12f   :  { %v388_v52 = vadd.f32 %v387_v44, %v364_v41  ;;  %v365_v53 = vmul.f32 %v2306_v42, %v2306_v42  ;;  %v333_v58 = vadd.f32 %v332_v45, %v2306_v42  ;;  %v2355_v44 = vadd.f32 %v2254_v0, %v2245_v55 }
 0x131   :  { %v389_v62 = vadd.f32 %v388_v52, %v365_v53  ;;  %v373_v55 = vmul.f32 %v2355_v44, %v2355_v44 }
 0x132   :  { %v257_v43 = vpop.f32.mrb[16].mxu0 }
 0x133   :  { %v2310_v46 = vadd.f32 %v2254_v0, %v257_v43  ;;  %v1675_v47 = vpop.f32.mrb[17].mxu0  ;;  %v2312_v48 = vpop.f32.mrb[16].mxu1 }
 0x134   :  { %v260_v49 = vpop.f32.mrb[18].mxu0  ;;  %v1703_v50 = vpop.f32.mrb[17].mxu1 }
 0x135   :  { %v1676_v54 = vpop.f32.mrb[19].mxu0  ;;  %v2316_v56 = vpop.f32.mrb[18].mxu1  ;;  %v366_v60 = vmul.f32 %v2310_v46, %v2310_v46  ;;  %v2322_v61 = vadd.f32 %v2254_v0, %v260_v49  ;;  %v334_v2 = vadd.f32 %v333_v58, %v2310_v46  ;;  %v372_v49 = vmul.f32 %v2345_v35, %v2345_v35 }
 0x136   :  { %v1704_v57 = vpop.f32.mrb[19].mxu1  ;;  %v2364_v50 = vadd.f32 %v2254_v0, %v2247_v59  ;;  %v2371_v54 = vadd.f32 %v2254_v0, %v2249_v63  ;;  %v2378_v59 = vadd.f32 %v2254_v0, %v2267_v9  ;;  %v2385_v63 = vadd.f32 %v2254_v0, %v2278_v17 }
 0x137   :  { %v390_v7 = vadd.f32 %v389_v62, %v366_v60  ;;  %v367_v8 = vmul.f32 %v2322_v61, %v2322_v61  ;;  %v335_v16 = vadd.f32 %v334_v2, %v2322_v61  ;;  %v2392_v9 = vadd.f32 %v2254_v0, %v2292_v29 }
 0x138   :  { %v374_v60 = vmul.f32 %v2364_v50, %v2364_v50  ;;  %v377_v17 = vmul.f32 %v2385_v63, %v2385_v63 }
 0x139   :  { %v391_v24 = vadd.f32 %v390_v7, %v367_v8 }
 0x13a   :  { %v265_v6 = vpop.f32.mrb[20].mxu0 }
 0x13b   :  { %v2328_v10 = vadd.f32 %v2254_v0, %v265_v6  ;;  %v1679_v11 = vpop.f32.mrb[21].mxu0  ;;  %v321_v12 = vpop.f32.mrb[20].mxu1  ;;  %v375_v6 = vmul.f32 %v2371_v54, %v2371_v54 }
 0x13c   :  { %v268_v13 = vpop.f32.mrb[22].mxu0  ;;  %v1707_v14 = vpop.f32.mrb[21].mxu1  ;;  %v376_v11 = vmul.f32 %v2378_v59, %v2378_v59 }
 0x13d   :  { %v368_v18 = vmul.f32 %v2328_v10, %v2328_v10  ;;  %v2334_v19 = vadd.f32 %v2254_v0, %v268_v13  ;;  %v1680_v20 = vpop.f32.mrb[23].mxu0  ;;  %v324_v22 = vpop.f32.mrb[22].mxu1  ;;  %v336_v25 = vadd.f32 %v335_v16, %v2328_v10  ;;  %v2397_v16 = vadd.f32 %v2254_v0, %v2298_v36 }
 0x13e   :  { %v1708_v23 = vpop.f32.mrb[23].mxu1 }
 0x13f   :  { %v392_v26 = vadd.f32 %v391_v24, %v368_v18  ;;  %v369_v28 = vmul.f32 %v2334_v19, %v2334_v19  ;;  %v337_v31 = vadd.f32 %v336_v25, %v2334_v19  ;;  %v378_v23 = vmul.f32 %v2392_v9, %v2392_v9 }
 0x140   :  { %v2407_v24 = vadd.f32 %v2254_v0, %v2312_v48  ;;  %v379_v36 = vmul.f32 %v2397_v16, %v2397_v16 }
 0x141   :  { %v393_v38 = vadd.f32 %v392_v26, %v369_v28  ;;  %v2414_v28 = vadd.f32 %v2254_v0, %v2316_v56 }
 0x142   :  { %v273_v30 = vpop.f32.mrb[24].mxu0 }
 0x143   :  { %v2341_v32 = vadd.f32 %v2254_v0, %v273_v30  ;;  %v1683_v33 = vpop.f32.mrb[25].mxu0  ;;  %v322_v30 = vadd.f32 %v2254_v0, %v321_v12 }
 0x144   :  { %v276_v37 = vpop.f32.mrb[26].mxu0 }
 0x145   :  { %v338_v39 = vadd.f32 %v337_v31, %v2341_v32  ;;  %v370_v40 = vmul.f32 %v2341_v32, %v2341_v32  ;;  %v2351_v41 = vadd.f32 %v2254_v0, %v276_v37  ;;  %v1684_v43 = vpop.f32.mrb[27].mxu0  ;;  %v380_v37 = vmul.f32 %v2407_v24, %v2407_v24 }
 0x147   :  { %v394_v45 = vadd.f32 %v393_v38, %v370_v40  ;;  %v339_v47 = vadd.f32 %v338_v39, %v2351_v41  ;;  %v371_v51 = vmul.f32 %v2351_v41, %v2351_v41  ;;  %v381_v39 = vmul.f32 %v2414_v28, %v2414_v28 }
 0x148   :  { %v382_v40 = vmul.f32 %v322_v30, %v322_v30 }
 0x149   :  { %v340_v52 = vadd.f32 %v339_v47, %v2345_v35  ;;  %v395_v53 = vadd.f32 %v394_v45, %v371_v51 }
 0x14b   :  { %v341_v57 = vadd.f32 %v340_v52, %v2355_v44  ;;  %v396_v58 = vadd.f32 %v395_v53, %v372_v49 }
 0x14d   :  { %v342_v62 = vadd.f32 %v341_v57, %v2364_v50  ;;  %v397_v2 = vadd.f32 %v396_v58, %v373_v55 }
 0x14f   :  { %v398_v7 = vadd.f32 %v397_v2, %v374_v60  ;;  %v343_v8 = vadd.f32 %v342_v62, %v2371_v54 }
 0x151   :  { %v344_v13 = vadd.f32 %v343_v8, %v2378_v59  ;;  %v399_v14 = vadd.f32 %v398_v7, %v375_v6 }
 0x153   :  { %v345_v18 = vadd.f32 %v344_v13, %v2385_v63  ;;  %v400_v20 = vadd.f32 %v399_v14, %v376_v11  ;;  %v425_v14 = vlaneseq }
 0x155   :  { %v346_v22 = vadd.f32 %v345_v18, %v2392_v9  ;;  %v401_v29 = vadd.f32 %v400_v20, %v377_v17  ;;  %v426_v17 = vshrl.u32 %v425_v14, 7  ;;  %v417_v18 = vld [vmem:[%s3124_s4] sm:$0x1] }
 0x157   :  { %v402_v25 = vadd.f32 %v401_v29, %v378_v23  ;;  %v347_v26 = vadd.f32 %v346_v22, %v2397_v16  ;;  %v2426_v20 = vsub.s32 0, %v426_v17  ;;  %v421_v29 = vld [vmem:[%s3125_s5] sm:$0x1] }
 0x159   :  { %v403_v31 = vadd.f32 %v402_v25, %v379_v36  ;;  %v348_v33 = vadd.f32 %v347_v26, %v2407_v24 }
 0x15b   :  { %v404_v48 = vadd.f32 %v403_v31, %v380_v37  ;;  %v349_v38 = vadd.f32 %v348_v33, %v2414_v28 }
 0x15d   :  { %v405_v43 = vadd.f32 %v404_v48, %v381_v39  ;;  %v350_v45 = vadd.f32 %v349_v38, %v322_v30  ;;  %v2442_v38 = vstv %s486_s26 }
 0x15f   :  { %v351_v47 = vrot.slane %v350_v45, 4  ;;  %v406_v56 = vadd.f32 %v405_v43, %v382_v40 }
 0x161   :  { %v352_v51 = vadd.f32 %v351_v47, %v350_v45  ;;  %v407_v49 = vrot.slane %v406_v56, 4 }
 0x163   :  { %v353_v0 = vrot.slane %v352_v51, 2  ;;  %v408_v12 = vadd.f32 %v407_v49, %v406_v56 }
 0x165   :  { %v354_v52 = vadd.f32 %v353_v0, %v352_v51  ;;  %v409_v53 = vrot.slane %v408_v12, 2 }
 0x167   :  { %v355_v55 = vrot.slane %v354_v52, 1  ;;  %v410_v57 = vadd.f32 %v409_v53, %v408_v12 }
 0x169   :  { %v356_v58 = vadd.f32 %v355_v55, %v354_v52  ;;  %v411_v60 = vrot.slane %v410_v57, 1 }
 0x16b   :  { %v357_v62 = vmul.f32 0.005, %v356_v58  ;;  %v412_v2 = vadd.f32 %v411_v60, %v410_v57 }
 0x16d   :  { %v413_v6 = vmul.f32 0.005, %v412_v2  ;;  %v414_v7 = vmul.f32 %v357_v62, %v357_v62 }
 0x16f   :  { %v415_v8 = vsub.f32 %v413_v6, %v414_v7  ;;  %v565_v6 = vld [vmem:[%s3126_s6 + $0x10] sm:$0xff]  ;;  %v566_v7 = vld [vmem:[%s3126_s6 + $0x18] sm:$0xff] }
 0x170   :  { %vm590_vm9 = vcmp.ge.u32.totalorder %v565_v6, 2147483648  ;;  %vm591_vm10 = vcmp.ge.u32.totalorder %v566_v7, 2147483648 }
 0x171   :  { %v416_v11 = vmax.f32 %v415_v8, 0.0  ;;  %vm1511_vm15 = vmpackc.low %vm591_vm10, %vm590_vm9 }
 0x173   :  { %v418_v13 = vadd.f32 1e-05, %v416_v11 }
 0x175   :  { %1877 = vrsqrt.f32 %v418_v13 }
 0x17f   :  { %v1878_v22 = vpop.eup %1877 }
 0x180   :  { %v420_v23 = vmul.f32 %v1878_v22, %v417_v18 }
 0x182   :  { %v422_v36 = vmul.f32 %v420_v23, %v357_v62  ;;  %v2432_v25 = vrot.slane %v420_v23, %v2426_v20 }
 0x184   :  { %v423_v26 = vsub.f32 %v421_v29, %v422_v36  ;;  %v454_v31 = vmul.f32 %v2432_v25, %v322_v30  ;;  %v430_v37 = vmul.f32 %v2432_v25, %v2260_v4  ;;  %v431_v48 = vmul.f32 %v2432_v25, %v2257_v3  ;;  %v563_v4 = vld [vmem:[%s3126_s6] sm:$0xff]  ;;  %v564_v3 = vld [vmem:[%s3126_s6 + $0x8] sm:$0xff] }
 0x185   :  { %v432_v39 = vmul.f32 %v2432_v25, %v2263_v5  ;;  %v433_v40 = vmul.f32 %v2432_v25, %v2276_v15  ;;  %vm588_vm4 = vcmp.ge.u32.totalorder %v563_v4, 2147483648  ;;  %vm589_vm5 = vcmp.ge.u32.totalorder %v564_v3, 2147483648 }
 0x186   :  { %v2436_v33 = vrot.slane %v423_v26, %v2426_v20  ;;  %v434_v0 = vmul.f32 %v2432_v25, %v2282_v21  ;;  %v435_v12 = vmul.f32 %v2432_v25, %v2290_v27  ;;  %vm1508_vm8 = vmpackc.low %vm589_vm5, %vm588_vm4  ;;  %v436_v21 = vmul.f32 %v2432_v25, %v2296_v34  ;;  %v567_v26 = vld [vmem:[%s3126_s6 + $0x20] sm:$0xff] }
 0x187   :  { %v437_v27 = vmul.f32 %v2432_v25, %v2306_v42  ;;  %vm592_vm1 = vcmp.ge.u32.totalorder %v567_v26, 2147483648  ;;  %v449_v6 = vmul.f32 %v2432_v25, %v2385_v63 }
 0x188   :  { %v2449_v43 = vadd.f32 %v2436_v33, %v454_v31  ;;  %v461_v30 = vadd.f32 %v2436_v33, %v430_v37  ;;  %v462_v45 = vadd.f32 %v2436_v33, %v431_v48  ;;  %v463_v5 = vadd.f32 %v2436_v33, %v432_v39  ;;  %v568_v48 = vld [vmem:[%s3126_s6 + $0x28] sm:$0xff] }
 0x189   :  { %v464_v47 = vadd.f32 %v2436_v33, %v433_v40  ;;  %v465_v60 = vadd.f32 %v2436_v33, %v434_v0  ;;  %v466_v62 = vadd.f32 %v2436_v33, %v435_v12  ;;  %v467_v13 = vadd.f32 %v2436_v33, %v436_v21 }
 0x18a   :  { %v2463_v15 = vmul.f32 %v2442_v38, %v2449_v43  ;;  %vm487_vm2 = vcmp.ge.f32.partialorder %v461_v30, 0.0  ;;  %vm488_vm3 = vcmp.ge.f32.partialorder %v462_v45, 0.0  ;;  %v513_v56 = vmul.f32 %v2442_v38, %v461_v30 }
 0x18b   :  { %v514_v51 = vmul.f32 %v2442_v38, %v462_v45  ;;  %v515_v55 = vmul.f32 %v2442_v38, %v463_v5  ;;  %v516_v57 = vmul.f32 %v2442_v38, %v464_v47  ;;  %vm489_vm6 = vcmp.ge.f32.partialorder %v463_v5, 0.0 }
 0x18c   :  { %v538_v49 = vsel %vm487_vm2, %v461_v30, %v513_v56  ;;  %vm490_vm7 = vcmp.ge.f32.partialorder %v464_v47, 0.0  ;;  %v468_v14 = vadd.f32 %v2436_v33, %v437_v27  ;;  %v517_v34 = vmul.f32 %v2442_v38, %v465_v60  ;;  %v2504_v30 = vld [vmem:[%s3126_s6 + $0x30] sm:$0xff]  ;;  %v571_v27 = vld [vmem:[%s3126_s6 + $0x40] sm:$0xff] }
 0x18d   :  { %v539_v52 = vsel %vm488_vm3, %v462_v45, %v514_v51  ;;  %v613_v53 = vmul.f32 2.0, %v538_v49  ;;  %v540_v8 = vsel %vm489_vm6, %v463_v5, %v515_v55  ;;  %v541_v11 = vsel %vm490_vm7, %v464_v47, %v516_v57  ;;  %v570_v5 = vld [vmem:[%s3126_s6 + $0x38] sm:$0xff] }
 0x18e   :  { %v614_v58 = vmul.f32 2.0, %v539_v52  ;;  %v518_v42 = vmul.f32 %v2442_v38, %v466_v62  ;;  %v615_v17 = vmul.f32 2.0, %v540_v8  ;;  %v616_v18 = vmul.f32 2.0, %v541_v11 }
 0x18f   :  { %vm491_vm11 = vcmp.ge.f32.partialorder %v465_v60, 0.0  ;;  %vm492_vm12 = vcmp.ge.f32.partialorder %v466_v62, 0.0  ;;  %v519_v22 = vmul.f32 %v2442_v38, %v467_v13  ;;  %v520_v23 = vmul.f32 %v2442_v38, %v468_v14 }
 0x190   :  { %v1509_v2 = vpack.c.bf16 %v614_v58, %v613_v53  ;;  %vm493_vm13 = vcmp.ge.f32.partialorder %v467_v13, 0.0  ;;  %vm494_vm14 = vcmp.ge.f32.partialorder %v468_v14, 0.0  ;;  %v542_v29 = vsel %vm491_vm11, %v465_v60, %v517_v34 }
 0x191   :  { %v543_v36 = vsel %vm492_vm12, %v466_v62, %v518_v42  ;;  %v438_v31 = vmul.f32 %v2432_v25, %v2310_v46  ;;  %v1512_v37 = vpack.c.bf16 %v616_v18, %v615_v17  ;;  %v544_v39 = vsel %vm493_vm13, %v467_v13, %v519_v22 }
 0x192   :  { %1726 = vmatmul.mubr.msk.bf16.vlgmr.msra.gmra.mrb[24].mxu1 %vm1508_vm8, %v1509_v2  ;;  %v545_v40 = vsel %vm494_vm14, %v468_v14, %v520_v23  ;;  %v439_v45 = vmul.f32 %v2432_v25, %v2322_v61  ;;  %v617_v46 = vmul.f32 2.0, %v542_v29  ;;  %v618_v3 = vmul.f32 2.0, %v543_v36 }
 0x193   :  { %1729 = vmatprep.mubr.msk.bf16.mxu1 %vm1975_vm0, %v1974_v1  ;;  %v469_v4 = vadd.f32 %v2436_v33, %v438_v31  ;;  %vm593_vm2 = vcmp.ge.u32.totalorder %v568_v48, 2147483648  ;;  %v440_v56 = vmul.f32 %v2432_v25, %v2328_v10  ;;  %v446_v61 = vmul.f32 %v2432_v25, %v2364_v50 }
 0x194   :  { %v470_v47 = vadd.f32 %v2436_v33, %v439_v45  ;;  %vm594_vm3 = vcmp.ge.u32.totalorder %v2504_v30, 2147483648  ;;  %v2520_v51 = vmul.f32 2.0, %v544_v39  ;;  %v2522_v49 = vmul.f32 2.0, %v545_v40  ;;  %vm1514_vm6 = vmpackc.low %vm593_vm2, %vm592_vm1 }
 0x195   :  { %v441_v0 = vmul.f32 %v2432_v25, %v2334_v19  ;;  %v447_v12 = vmul.f32 %v2432_v25, %v2371_v54  ;;  %vm595_vm4 = vcmp.ge.u32.totalorder %v570_v5, 2147483648  ;;  %v521_v52 = vmul.f32 %v2442_v38, %v469_v4 }
 0x196   :  { %v2530_v10 = vadd.f32 %v2436_v33, %v440_v56  ;;  %v477_v50 = vadd.f32 %v2436_v33, %v446_v61  ;;  %v1515_v53 = vpack.c.bf16 %v618_v3, %v617_v46  ;;  %vm495_vm5 = vcmp.ge.f32.partialorder %v469_v4, 0.0 }
 0x197   :  { %v2534_v55 = vadd.f32 %v2436_v33, %v441_v0  ;;  %v478_v57 = vadd.f32 %v2436_v33, %v447_v12  ;;  %v522_v19 = vmul.f32 %v2442_v38, %v470_v47  ;;  %v448_v58 = vmul.f32 %v2432_v25, %v2378_v59 }
 0x198   :  { %vm503_vm7 = vcmp.ge.f32.partialorder %v477_v50, 0.0  ;;  %v529_v54 = vmul.f32 %v2442_v38, %v477_v50  ;;  %v1518_v60 = vpack.c.bf16 %v2522_v49, %v2520_v51  ;;  %vm496_vm8 = vcmp.ge.f32.partialorder %v470_v47, 0.0 }
 0x199   :  { %vm504_vm9 = vcmp.ge.f32.partialorder %v478_v57, 0.0  ;;  %v530_v62 = vmul.f32 %v2442_v38, %v478_v57  ;;  %v546_v21 = vsel %vm495_vm5, %v469_v4, %v521_v52  ;;  %v479_v7 = vadd.f32 %v2436_v33, %v448_v58 }
 0x19a   :  { %1730 = vmatmul.mubr.msk.bf16.gmra.mrb[28].mxu1 %vm1511_vm15, %v1512_v37  ;;  %v554_v2 = vsel %vm503_vm7, %v477_v50, %v529_v54  ;;  %v450_v11 = vmul.f32 %v2432_v25, %v2392_v9  ;;  %v451_v13 = vmul.f32 %v2432_v25, %v2397_v16  ;;  %v547_v14 = vsel %vm496_vm8, %v470_v47, %v522_v19  ;;  %vm1517_vm15 = vmpackc.low %vm595_vm4, %vm594_vm3 }
 0x19b   :  { %1733 = vmatprep.mubr.msk.bf16.mxu1 %vm1975_vm0, %v1974_v1  ;;  %v555_v59 = vsel %vm504_vm9, %v478_v57, %v530_v62  ;;  %v2552_v8 = vmul.f32 2.0, %v554_v2  ;;  %v480_v63 = vadd.f32 %v2436_v33, %v449_v6  ;;  %vm505_vm10 = vcmp.ge.f32.partialorder %v479_v7, 0.0  ;;  %v574_v62 = vld [vmem:[%s3126_s6 + $0x58] sm:$0xff] }
 0x19c   :  { %v2560_v34 = vmul.f32 2.0, %v555_v59  ;;  %vm596_vm11 = vcmp.ge.u32.totalorder %v571_v27, 2147483648  ;;  %v531_v42 = vmul.f32 %v2442_v38, %v479_v7  ;;  %v481_v17 = vadd.f32 %v2436_v33, %v450_v11 }
 0x19d   :  { %v482_v18 = vadd.f32 %v2436_v33, %v451_v13  ;;  %v452_v9 = vmul.f32 %v2432_v25, %v2407_v24  ;;  %vm506_vm12 = vcmp.ge.f32.partialorder %v480_v63, 0.0  ;;  %v532_v22 = vmul.f32 %v2442_v38, %v480_v63  ;;  %v575_v13 = vld [vmem:[%s3126_s6 + $0x60] sm:$0xff] }
 0x19e   :  { %v1533_v16 = vpack.c.bf16 %v2560_v34, %v2552_v8  ;;  %v453_v23 = vmul.f32 %v2432_v25, %v2414_v28  ;;  %v556_v29 = vsel %vm505_vm10, %v479_v7, %v531_v42  ;;  %vm507_vm13 = vcmp.ge.f32.partialorder %v481_v17, 0.0  ;;  %v572_v28 = vld [vmem:[%s3126_s6 + $0x48] sm:$0xff]  ;;  %v585_v8 = vld [vmem:[%s3126_s6 + $0xb0] sm:$0xff]  ;;  %v586_v34 = vld [vmem:[%s3126_s6 + $0xb8] sm:$0xff] }
 0x19f   :  { %vm508_vm14 = vcmp.ge.f32.partialorder %v482_v18, 0.0  ;;  %v533_v36 = vmul.f32 %v2442_v38, %v481_v17  ;;  %v557_v26 = vsel %vm506_vm12, %v480_v63, %v532_v22  ;;  %v2577_v24 = vmul.f32 2.0, %v556_v29 }
 0x1a0   :  { %v534_v31 = vmul.f32 %v2442_v38, %v482_v18  ;;  %v483_v37 = vadd.f32 %v2436_v33, %v452_v9  ;;  %v2584_v48 = vmul.f32 2.0, %v557_v26  ;;  %v484_v40 = vadd.f32 %v2436_v33, %v453_v23  ;;  %v578_v23 = vld [vmem:[%s3126_s6 + $0x78] sm:$0xff]  ;;  %v579_v26 = vld [vmem:[%s3126_s6 + $0x80] sm:$0xff] }
 0x1a1   :  { %v558_v39 = vsel %vm507_vm13, %v481_v17, %v533_v36  ;;  %vm511_vm1 = vcmp.ge.f32.partialorder %v2449_v43, 0.0  ;;  %vm597_vm4 = vcmp.ge.u32.totalorder %v572_v28, 2147483648  ;;  %v621_v47 = vmul.f32 2.0, %v546_v21  ;;  %v582_v28 = vld [vmem:[%s3126_s6 + $0x98] sm:$0xff] }
 0x1a2   :  { %1734 = vmatmul.mubr.msk.bf16.gmra.mrb[32].mxu1 %vm1514_vm6, %v1515_v53  ;;  %v559_v30 = vsel %vm508_vm14, %v482_v18, %v534_v31  ;;  %v2588_v45 = vmul.f32 2.0, %v558_v39  ;;  %vm509_vm2 = vcmp.ge.f32.partialorder %v483_v37, 0.0  ;;  %v535_v4 = vmul.f32 %v2442_v38, %v483_v37  ;;  %vm1520_vm7 = vmpackc.low %vm597_vm4, %vm596_vm11  ;;  %v580_v31 = vld [vmem:[%s3126_s6 + $0x88] sm:$0xff]  ;;  %v583_v39 = vld [vmem:[%s3126_s6 + $0xa0] sm:$0xff] }
 0x1a3   :  { %1737 = vmatprep.mubr.msk.bf16.mxu1 %vm1975_vm0, %v1974_v1  ;;  %v1536_v46 = vpack.c.bf16 %v2584_v48, %v2577_v24  ;;  %v2593_v3 = vmul.f32 2.0, %v559_v30  ;;  %vm510_vm3 = vcmp.ge.f32.partialorder %v484_v40, 0.0  ;;  %v536_v5 = vmul.f32 %v2442_v38, %v484_v40  ;;  %v1869_v30 = vld [vmem:[#allocation7] sm:$0xff]  }
 0x1a4   :  { %v560_v56 = vsel %vm509_vm2, %v483_v37, %v535_v4  ;;  %v2600_v61 = vsel %vm511_vm1, %v2449_v43, %v2463_v15  ;;  %v622_v51 = vmul.f32 2.0, %v547_v14  ;;  %v523_v52 = vmul.f32 %v2442_v38, %v2530_v10  ;;  %v576_v14 = vld [vmem:[%s3126_s6 + $0x68] sm:$0xff]  ;;  %v581_v37 = vld [vmem:[%s3126_s6 + $0x90] sm:$0xff]  ;;  %1778 = vmatpush3.bf16.msra.mxu0 %v1869_v30 }
 0x1a5   :  { %v1539_v49 = vpack.c.bf16 %v2593_v3, %v2588_v45  ;;  %v561_v0 = vsel %vm510_vm3, %v484_v40, %v536_v5  ;;  %v2604_v12 = vmul.f32 2.0, %v560_v56  ;;  %v524_v50 = vmul.f32 %v2442_v38, %v2534_v55  ;;  %v584_v40 = vld [vmem:[%s3126_s6 + $0xa8] sm:$0xff]  ;;  %1779 = vmatprep.subr.bf16.mxu0 %v1974_v1 }
 0x1a6   :  { %v2610_v53 = vmul.f32 2.0, %v561_v0  ;;  %vm497_vm5 = vcmp.ge.f32.partialorder %v2530_v10, 0.0  ;;  %vm498_vm6 = vcmp.ge.f32.partialorder %v2534_v55, 0.0  ;;  %v442_v43 = vmul.f32 %v2432_v25, %v2341_v32  ;;  %v1870_v0 = vld [vmem:[#allocation7 + $0x8] sm:$0xff]  }
 0x1a7   :  { %v443_v15 = vmul.f32 %v2432_v25, %v2351_v41  ;;  %v1521_v19 = vpack.c.bf16 %v622_v51, %v621_v47  ;;  %v548_v54 = vsel %vm497_vm5, %v2530_v10, %v523_v52  ;;  %v549_v58 = vsel %vm498_vm6, %v2534_v55, %v524_v50 }
 0x1a8   :  { %v1542_v57 = vpack.c.bf16 %v2610_v53, %v2604_v12  ;;  %v473_v32 = vadd.f32 %v2436_v33, %v442_v43  ;;  %vm599_vm9 = vcmp.ge.u32.totalorder %v574_v62, 2147483648  ;;  %v623_v10 = vmul.f32 2.0, %v548_v54  ;;  %1780 = vmatpush3.bf16.msra.mxu0 %v1870_v0  ;;  %v1872_v53 = vld [vmem:[#allocation7 + $0x18] sm:$0xff]  }
 0x1a9   :  { %v474_v41 = vadd.f32 %v2436_v33, %v443_v15  ;;  %v624_v55 = vmul.f32 2.0, %v549_v58  ;;  %v444_v2 = vmul.f32 %v2432_v25, %v2345_v35  ;;  %v445_v6 = vmul.f32 %v2432_v25, %v2355_v44  ;;  %1781 = vmatprep.subr.bf16.mxu0 %v1974_v1  ;;  %v2715_v43 = vld [vmem:[%s3128_s8] ss:$0 sm:$0xff]  ;;  %v1873_v58 = vld [vmem:[#allocation7 + $0x20] sm:$0xff]  }
 0x1aa   :  { %1738 = vmatmul.mubr.msk.bf16.gmra.mrb[36].mxu1 %vm1517_vm15, %v1518_v60  ;;  %v573_v60 = vld [vmem:[%s3126_s6 + $0x50] sm:$0xff]  ;;  %v525_v21 = vmul.f32 %v2442_v38, %v473_v32  ;;  %vm499_vm10 = vcmp.ge.f32.partialorder %v473_v32, 0.0  ;;  %vm600_vm13 = vcmp.ge.u32.totalorder %v575_v13, 2147483648  ;;  %vm601_vm14 = vcmp.ge.u32.totalorder %v576_v14, 2147483648 }
 0x1ab   :  { %1741 = vmatprep.mubr.msk.bf16.mxu1 %vm1975_vm0, %v1974_v1  ;;  %vm598_vm8 = vcmp.ge.u32.totalorder %v573_v60, 2147483648  ;;  %v526_v27 = vmul.f32 %v2442_v38, %v474_v41  ;;  %vm500_vm11 = vcmp.ge.f32.partialorder %v474_v41, 0.0  ;;  %v1524_v7 = vpack.c.bf16 %v624_v55, %v623_v10  ;;  %vm1526_vm2 = vmpackc.low %vm601_vm14, %vm600_vm13  ;;  %v1874_v10 = vld [vmem:[#allocation7 + $0x28] sm:$0xff]  }
 0x1ac   :  { %vm1523_vm12 = vmpackc.low %vm599_vm9, %vm598_vm8  ;;  %v550_v59 = vsel %vm499_vm10, %v473_v32, %v525_v21  ;;  %v475_v63 = vadd.f32 %v2436_v33, %v444_v2  ;;  %v476_v42 = vadd.f32 %v2436_v33, %v445_v6  ;;  %v577_v33 = vld [vmem:[%s3126_s6 + $0x70] sm:$0xff]  ;;  %vm603_vm4 = vcmp.ge.u32.totalorder %v578_v23, 2147483648 }
 0x1ad   :  { %v551_v11 = vsel %vm500_vm11, %v474_v41, %v526_v27  ;;  %v625_v35 = vmul.f32 2.0, %v550_v59  ;;  %vm602_vm3 = vcmp.ge.u32.totalorder %v577_v33, 2147483648  ;;  %vm604_vm6 = vcmp.ge.u32.totalorder %v579_v26, 2147483648 }
 0x1ae   :  { %v626_v44 = vmul.f32 2.0, %v551_v11  ;;  %v527_v25 = vmul.f32 %v2442_v38, %v475_v63  ;;  %v528_v17 = vmul.f32 %v2442_v38, %v476_v42  ;;  %vm501_vm15 = vcmp.ge.f32.partialorder %v475_v63, 0.0  ;;  %vm1529_vm5 = vmpackc.low %vm603_vm4, %vm602_vm3 }
 0x1af   :  { %vm502_vm1 = vcmp.ge.f32.partialorder %v476_v42, 0.0  ;;  %vm606_vm9 = vcmp.ge.u32.totalorder %v581_v37, 2147483648  ;;  %vm607_vm10 = vcmp.ge.u32.totalorder %v582_v28, 2147483648  ;;  %vm609_vm13 = vcmp.ge.u32.totalorder %v584_v40, 2147483648 }
 0x1b0   :  { %v1527_v18 = vpack.c.bf16 %v626_v44, %v625_v35  ;;  %v552_v9 = vsel %vm501_vm15, %v475_v63, %v527_v25  ;;  %v553_v22 = vsel %vm502_vm1, %v476_v42, %v528_v17  ;;  %vm1535_vm11 = vmpackc.low %vm607_vm10, %vm606_vm9  ;;  %vm610_vm15 = vcmp.ge.u32.totalorder %v585_v8, 2147483648  ;;  %v1875_v63 = vld [vmem:[#allocation7 + $0x30] sm:$0xff]  }
 0x1b1   :  { %v627_v38 = vmul.f32 2.0, %v552_v9  ;;  %v628_v29 = vmul.f32 2.0, %v553_v22  ;;  %vm611_vm1 = vcmp.ge.u32.totalorder %v586_v34, 2147483648  ;;  %v637_v24 = vmul.f32 2.0, %v2600_v61  ;;  %v1871_v61 = vld [vmem:[#allocation7 + $0x10] sm:$0xff]   ;;  %v1876_v9 = vld [vmem:[#allocation7 + $0x38] sm:$0xff]  }
 0x1b2   :  { %1742 = vmatmul.mubr.msk.bf16.gmra.mrb[40].mxu1 %vm1520_vm7, %v1521_v19  ;;  %vm605_vm7 = vcmp.ge.u32.totalorder %v580_v31, 2147483648  ;;  %1782 = vmatpush3.bf16.msra.mxu0 %v1871_v61 }
 0x1b3   :  { %1745 = vmatprep.mubr.msk.bf16.mxu1 %vm1975_vm0, %v1974_v1  ;;  %v1530_v36 = vpack.c.bf16 %v628_v29, %v627_v38  ;;  %vm1532_vm8 = vmpackc.low %vm605_vm7, %vm604_vm6  ;;  %v1545_v48 = vpack.c.bf16 %v637_v24, %v637_v24  ;;  %1783 = vmatprep.subr.bf16.mxu0 %v1974_v1 }
 0x1b6   :  { %1784 = vmatpush3.bf16.msra.mxu0 %v1872_v53 }
 0x1b7   :  { %1785 = vmatprep.subr.bf16.mxu0 %v1974_v1 }
 0x1ba   :  { %1746 = vmatmul.mubr.msk.bf16.gmra.mrb[44].mxu1 %vm1523_vm12, %v1524_v7  ;;  %vm608_vm12 = vcmp.ge.u32.totalorder %v583_v39, 2147483648  ;;  %1786 = vmatpush3.bf16.msra.mxu0 %v1873_v58 }
 0x1bb   :  { %1749 = vmatprep.mubr.msk.bf16.mxu1 %vm1975_vm0, %v1974_v1  ;;  %vm1538_vm14 = vmpackc.low %vm609_vm13, %vm608_vm12  ;;  %1787 = vmatprep.subr.bf16.mxu0 %v1974_v1 }
 0x1be   :  { %1788 = vmatpush3.bf16.msra.mxu0 %v1874_v10 }
 0x1bf   :  { %1789 = vmatprep.subr.bf16.mxu0 %v1974_v1 }
 0x1c2   :  { %1750 = vmatmul.mubr.msk.bf16.gmra.mrb[48].mxu1 %vm1526_vm2, %v1527_v18  ;;  %vm1541_vm2 = vmpackc.low %vm611_vm1, %vm610_vm15  ;;  %1790 = vmatpush3.bf16.msra.mxu0 %v1875_v63 }
 0x1c3   :  { %1753 = vmatprep.mubr.msk.bf16.mxu1 %vm1975_vm0, %v1974_v1  ;;  %1791 = vmatprep.subr.bf16.mxu0 %v1974_v1 }
 0x1c6   :  { %1792 = vmatpush3.bf16.msra.mxu0 %v1876_v9 }
 0x1ca   :  { %1754 = vmatmul.mubr.msk.bf16.gmra.mrb[52].mxu1 %vm1529_vm5, %v1530_v36 }
 0x1cb   :  { %1757 = vmatprep.mubr.msk.bf16.mxu1 %vm1975_vm0, %v1974_v1 }
 0x1d2   :  { %1758 = vmatmul.mubr.msk.bf16.gmra.mrb[56].mxu1 %vm1532_vm8, %v1533_v16  ;;  %v587_v16 = vld [vmem:[%s3126_s6 + $0xc0] sm:$0xff] }
 0x1d3   :  { %1761 = vmatprep.mubr.msk.bf16.mxu1 %vm1975_vm0, %v1974_v1  ;;  %vm612_vm3 = vcmp.ge.u32.totalorder %v587_v16, 2147483648 }
 0x1d4   :  { %vm1544_vm4 = vmpackc.low %vm612_vm3, %vm612_vm3 }
 0x1da   :  { %1762 = vmatmul.mubr.msk.bf16.gmra.mrb[60].mxu1 %vm1535_vm11, %v1536_v46 }
 0x1db   :  { %1765 = vmatprep.mubr.msk.bf16.mxu1 %vm1975_vm0, %v1974_v1 }
 0x1e2   :  { %1766 = vmatmul.mubr.msk.bf16.gmra.mrb[64].mxu1 %vm1538_vm14, %v1539_v49 }
 0x1e3   :  { %1769 = vmatprep.mubr.msk.bf16.mxu1 %vm1975_vm0, %v1974_v1 }
 0x1ea   :  { %1770 = vmatmul.mubr.msk.bf16.gmra.mrb[68].mxu1 %vm1541_vm2, %v1542_v57 }
 0x1eb   :  { %1773 = vmatprep.mubr.msk.bf16.mxu1 %vm1975_vm0, %v1974_v1 }
 0x1f2   :  { %1774 = vmatmul.mubr.msk.bf16.gmra.mrb[72].mxu1 %vm1544_vm4, %v1545_v48 }
 0x265   :  { %v781_v45 = vpop.f32.mrb[24].mxu1 }
 0x266   :  { %v1727_v4 = vpop.f32.mrb[25].mxu1  ;;  %v2721_v60 = vadd.f32 %v2715_v43, %v781_v45 }
 0x267   :  { %v784_v46 = vpop.f32.mrb[26].mxu1 }
 0x268   :  { %v1728_v3 = vpop.f32.mrb[27].mxu1  ;;  %v2718_v57 = vadd.f32 %v2715_v43, %v784_v46  ;;  %v914_v55 = vmul.f32 %v2721_v60, %v2721_v60 }
 0x26a   :  { %v915_v41 = vmul.f32 %v2718_v57, %v2718_v57  ;;  %v883_v21 = vadd.f32 %v2718_v57, %v2721_v60 }
 0x26c   :  { %v939_v7 = vadd.f32 %v915_v41, %v914_v55 }
 0x26d   :  { %v789_v5 = vpop.f32.mrb[28].mxu1 }
 0x26e   :  { %v1731_v47 = vpop.f32.mrb[29].mxu1  ;;  %v2724_v62 = vadd.f32 %v2715_v43, %v789_v5 }
 0x26f   :  { %v792_v56 = vpop.f32.mrb[30].mxu1 }
 0x270   :  { %v1732_v51 = vpop.f32.mrb[31].mxu1  ;;  %v916_v27 = vmul.f32 %v2724_v62, %v2724_v62  ;;  %v2736_v2 = vadd.f32 %v2715_v43, %v792_v56  ;;  %v884_v59 = vadd.f32 %v883_v21, %v2724_v62 }
 0x272   :  { %v940_v42 = vadd.f32 %v939_v7, %v916_v27  ;;  %v917_v35 = vmul.f32 %v2736_v2, %v2736_v2  ;;  %v885_v25 = vadd.f32 %v884_v59, %v2736_v2 }
 0x274   :  { %v941_v22 = vadd.f32 %v940_v42, %v917_v35 }
 0x275   :  { %v797_v49 = vpop.f32.mrb[32].mxu1 }
 0x276   :  { %v1735_v12 = vpop.f32.mrb[33].mxu1  ;;  %v2741_v11 = vadd.f32 %v2715_v43, %v797_v49 }
 0x277   :  { %v800_v52 = vpop.f32.mrb[34].mxu1 }
 0x278   :  { %v1736_v50 = vpop.f32.mrb[35].mxu1  ;;  %v918_v17 = vmul.f32 %v2741_v11, %v2741_v11  ;;  %v2750_v18 = vadd.f32 %v2715_v43, %v800_v52  ;;  %v886_v33 = vadd.f32 %v885_v25, %v2741_v11 }
 0x27a   :  { %v942_v29 = vadd.f32 %v941_v22, %v918_v17  ;;  %v919_v36 = vmul.f32 %v2750_v18, %v2750_v18  ;;  %v887_v37 = vadd.f32 %v886_v33, %v2750_v18 }
 0x27c   :  { %v943_v8 = vadd.f32 %v942_v29, %v919_v36 }
 0x27d   :  { %v805_v15 = vpop.f32.mrb[36].mxu1 }
 0x27e   :  { %v1739_v19 = vpop.f32.mrb[37].mxu1  ;;  %v2754_v23 = vadd.f32 %v2715_v43, %v805_v15 }
 0x27f   :  { %v808_v54 = vpop.f32.mrb[38].mxu1 }
 0x280   :  { %v1740_v32 = vpop.f32.mrb[39].mxu1  ;;  %v920_v28 = vmul.f32 %v2754_v23, %v2754_v23  ;;  %v2763_v39 = vadd.f32 %v2715_v43, %v808_v54  ;;  %v888_v34 = vadd.f32 %v887_v37, %v2754_v23 }
 0x282   :  { %v944_v24 = vadd.f32 %v943_v8, %v920_v28  ;;  %v921_v48 = vmul.f32 %v2763_v39, %v2763_v39  ;;  %v889_v45 = vadd.f32 %v888_v34, %v2763_v39 }
 0x284   :  { %v945_v47 = vadd.f32 %v944_v24, %v921_v48 }
 0x285   :  { %v813_v6 = vpop.f32.mrb[40].mxu1 }
 0x286   :  { %v1743_v13 = vpop.f32.mrb[41].mxu1  ;;  %v2767_v16 = vadd.f32 %v2715_v43, %v813_v6 }
 0x287   :  { %v816_v14 = vpop.f32.mrb[42].mxu1 }
 0x288   :  { %v1744_v44 = vpop.f32.mrb[43].mxu1  ;;  %v922_v4 = vmul.f32 %v2767_v16, %v2767_v16  ;;  %v2775_v46 = vadd.f32 %v2715_v43, %v816_v14  ;;  %v890_v56 = vadd.f32 %v889_v45, %v2767_v16 }
 0x28a   :  { %v946_v0 = vadd.f32 %v945_v47, %v922_v4  ;;  %v923_v12 = vmul.f32 %v2775_v46, %v2775_v46  ;;  %v891_v52 = vadd.f32 %v890_v56, %v2775_v46 }
 0x28c   :  { %v947_v15 = vadd.f32 %v946_v0, %v923_v12 }
 0x28d   :  { %v821_v38 = vpop.f32.mrb[44].mxu1 }
 0x28e   :  { %v1747_v26 = vpop.f32.mrb[45].mxu1  ;;  %v2779_v51 = vadd.f32 %v2715_v43, %v821_v38 }
 0x28f   :  { %v824_v31 = vpop.f32.mrb[46].mxu1 }
 0x290   :  { %v1748_v40 = vpop.f32.mrb[47].mxu1  ;;  %v924_v61 = vmul.f32 %v2779_v51, %v2779_v51  ;;  %v2787_v50 = vadd.f32 %v2715_v43, %v824_v31  ;;  %v892_v19 = vadd.f32 %v891_v52, %v2779_v51 }
 0x292   :  { %v948_v41 = vadd.f32 %v947_v15, %v924_v61  ;;  %v925_v10 = vmul.f32 %v2787_v50, %v2787_v50  ;;  %v893_v21 = vadd.f32 %v892_v19, %v2787_v50 }
 0x294   :  { %v949_v7 = vadd.f32 %v948_v41, %v925_v10 }
 0x295   :  { %v829_v30 = vpop.f32.mrb[48].mxu1 }
 0x296   :  { %v1751_v3 = vpop.f32.mrb[49].mxu1  ;;  %v2791_v54 = vadd.f32 %v2715_v43, %v829_v30 }
 0x297   :  { %v832_v5 = vpop.f32.mrb[50].mxu1 }
 0x298   :  { %v1752_v49 = vpop.f32.mrb[51].mxu1  ;;  %v926_v27 = vmul.f32 %v2791_v54, %v2791_v54  ;;  %v2799_v6 = vadd.f32 %v2715_v43, %v832_v5  ;;  %v894_v59 = vadd.f32 %v893_v21, %v2791_v54 }
 0x29a   :  { %v950_v63 = vadd.f32 %v949_v7, %v926_v27  ;;  %v927_v42 = vmul.f32 %v2799_v6, %v2799_v6  ;;  %v895_v25 = vadd.f32 %v894_v59, %v2799_v6 }
 0x29c   :  { %v951_v33 = vadd.f32 %v950_v63, %v927_v42 }
 0x29d   :  { %v837_v53 = vpop.f32.mrb[52].mxu1 }
 0x29e   :  { %v1755_v58 = vpop.f32.mrb[53].mxu1  ;;  %v2803_v13 = vadd.f32 %v2715_v43, %v837_v53 }
 0x29f   :  { %v840_v32 = vpop.f32.mrb[54].mxu1 }
 0x2a0   :  { %v1756_v55 = vpop.f32.mrb[55].mxu1  ;;  %v928_v17 = vmul.f32 %v2803_v13, %v2803_v13  ;;  %v2811_v9 = vadd.f32 %v2715_v43, %v840_v32  ;;  %v896_v38 = vadd.f32 %v895_v25, %v2803_v13 }
 0x2a2   :  { %v952_v36 = vadd.f32 %v951_v33, %v928_v17  ;;  %v929_v26 = vmul.f32 %v2811_v9, %v2811_v9  ;;  %v897_v37 = vadd.f32 %v896_v38, %v2811_v9 }
 0x2a4   :  { %v953_v24 = vadd.f32 %v952_v36, %v929_v26 }
 0x2a5   :  { %v845_v14 = vpop.f32.mrb[56].mxu1 }
 0x2a6   :  { %v1759_v35 = vpop.f32.mrb[57].mxu1  ;;  %v2815_v29 = vadd.f32 %v2715_v43, %v845_v14 }
 0x2a7   :  { %v848_v44 = vpop.f32.mrb[58].mxu1 }
 0x2a8   :  { %v1760_v22 = vpop.f32.mrb[59].mxu1  ;;  %v930_v28 = vmul.f32 %v2815_v29, %v2815_v29  ;;  %v2823_v40 = vadd.f32 %v2715_v43, %v848_v44  ;;  %v898_v48 = vadd.f32 %v897_v37, %v2815_v29 }
 0x2aa   :  { %v954_v4 = vadd.f32 %v953_v24, %v930_v28  ;;  %v931_v3 = vmul.f32 %v2823_v40, %v2823_v40  ;;  %v899_v5 = vadd.f32 %v898_v48, %v2823_v40 }
 0x2ac   :  { %v955_v0 = vadd.f32 %v954_v4, %v931_v3 }
 0x2ad   :  { %v853_v31 = vpop.f32.mrb[60].mxu1 }
 0x2ae   :  { %v1763_v8 = vpop.f32.mrb[61].mxu1  ;;  %v2827_v30 = vadd.f32 %v2715_v43, %v853_v31 }
 0x2af   :  { %v856_v34 = vpop.f32.mrb[62].mxu1 }
 0x2b0   :  { %v1764_v45 = vpop.f32.mrb[63].mxu1  ;;  %v932_v47 = vmul.f32 %v2827_v30, %v2827_v30  ;;  %v2835_v56 = vadd.f32 %v2715_v43, %v856_v34  ;;  %v900_v12 = vadd.f32 %v899_v5, %v2827_v30 }
 0x2b2   :  { %v956_v15 = vadd.f32 %v955_v0, %v932_v47  ;;  %v933_v19 = vmul.f32 %v2835_v56, %v2835_v56  ;;  %v901_v32 = vadd.f32 %v900_v12, %v2835_v56 }
 0x2b4   :  { %v957_v55 = vadd.f32 %v956_v15, %v933_v19 }
 0x2b5   :  { %v861_v49 = vpop.f32.mrb[64].mxu1 }
 0x2b6   :  { %v2839_v52 = vadd.f32 %v2715_v43, %v861_v49  ;;  %v1767_v61 = vpop.f32.mrb[65].mxu1 }
 0x2b7   :  { %v864_v53 = vpop.f32.mrb[66].mxu1 }
 0x2b8   :  { %v1768_v58 = vpop.f32.mrb[67].mxu1  ;;  %v934_v41 = vmul.f32 %v2839_v52, %v2839_v52  ;;  %v2847_v10 = vadd.f32 %v2715_v43, %v864_v53  ;;  %v902_v21 = vadd.f32 %v901_v32, %v2839_v52 }
 0x2ba   :  { %v958_v7 = vadd.f32 %v957_v55, %v934_v41  ;;  %v935_v59 = vmul.f32 %v2847_v10, %v2847_v10  ;;  %v903_v35 = vadd.f32 %v902_v21, %v2847_v10 }
 0x2bc   :  { %v959_v22 = vadd.f32 %v958_v7, %v935_v59  ;;  %v973_v59 = vld [vmem:[%s3129_s9] sm:$0x1] }
 0x2bd   :  { %v869_v27 = vpop.f32.mrb[68].mxu1 }
 0x2be   :  { %v2853_v14 = vadd.f32 %v2715_v43, %v869_v27  ;;  %v1771_v63 = vpop.f32.mrb[69].mxu1 }
 0x2bf   :  { %v872_v42 = vpop.f32.mrb[70].mxu1 }
 0x2c0   :  { %v936_v44 = vmul.f32 %v2853_v14, %v2853_v14  ;;  %v2859_v25 = vadd.f32 %v2715_v43, %v872_v42  ;;  %v1772_v17 = vpop.f32.mrb[71].mxu1  ;;  %v904_v33 = vadd.f32 %v903_v35, %v2853_v14  ;;  %v977_v35 = vld [vmem:[%s3130_s10] sm:$0x1] }
 0x2c2   :  { %v960_v38 = vadd.f32 %v959_v22, %v936_v44  ;;  %v937_v36 = vmul.f32 %v2859_v25, %v2859_v25  ;;  %v905_v31 = vadd.f32 %v904_v33, %v2859_v25 }
 0x2c4   :  { %v961_v34 = vadd.f32 %v960_v38, %v937_v36 }
 0x2c5   :  { %v877_v26 = vpop.f32.mrb[72].mxu1 }
 0x2c6   :  { %v878_v37 = vadd.f32 %v2715_v43, %v877_v26  ;;  %v1775_v28 = vpop.f32.mrb[73].mxu1 }
 0x2c7   :  { %v880_v8 = vpop.f32.mrb[74].mxu1 }
 0x2c8   :  { %v906_v24 = vadd.f32 %v905_v31, %v878_v37  ;;  %v938_v48 = vmul.f32 %v878_v37, %v878_v37  ;;  %v1776_v45 = vpop.f32.mrb[75].mxu1  ;;  %v2883_v31 = vstv %s1547_s16 }
 0x2ca   :  { %v907_v4 = vrot.slane %v906_v24, 4  ;;  %v962_v3 = vadd.f32 %v961_v34, %v938_v48 }
 0x2cc   :  { %v908_v5 = vadd.f32 %v907_v4, %v906_v24  ;;  %v963_v47 = vrot.slane %v962_v3, 4  ;;  %v1119_v24 = vld [vmem:[#allocation6] sm:$0xff] }
 0x2cd   :  { %vm1144_vm7 = vcmp.ge.u32.totalorder %v1119_v24, 2147483648 }
 0x2ce   :  { %v909_v49 = vrot.slane %v908_v5, 2  ;;  %v964_v0 = vadd.f32 %v963_v47, %v962_v3 }
 0x2d0   :  { %v910_v12 = vadd.f32 %v909_v49, %v908_v5  ;;  %v965_v61 = vrot.slane %v964_v0, 2 }
 0x2d2   :  { %v911_v53 = vrot.slane %v910_v12, 1  ;;  %v966_v15 = vadd.f32 %v965_v61, %v964_v0 }
 0x2d4   :  { %v912_v19 = vadd.f32 %v911_v53, %v910_v12  ;;  %v967_v58 = vrot.slane %v966_v15, 1 }
 0x2d6   :  { %v913_v32 = vmul.f32 0.005, %v912_v19  ;;  %v968_v43 = vadd.f32 %v967_v58, %v966_v15  ;;  %v1121_v58 = vld [vmem:[#allocation6 + $0x10] sm:$0xff] }
 0x2d7   :  { %vm1146_vm12 = vcmp.ge.u32.totalorder %v1121_v58, 2147483648 }
 0x2d8   :  { %v969_v41 = vmul.f32 0.005, %v968_v43  ;;  %v970_v55 = vmul.f32 %v913_v32, %v913_v32 }
 0x2da   :  { %v971_v21 = vsub.f32 %v969_v41, %v970_v55 }
 0x2dc   :  { %v972_v27 = vmax.f32 %v971_v21, 0.0 }
 0x2de   :  { %v974_v7 = vadd.f32 1e-05, %v972_v27 }
 0x2e0   :  { %1879 = vrsqrt.f32 %v974_v7 }
 0x2ea   :  { %v1880_v63 = vpop.eup %1879 }
 0x2eb   :  { %v976_v42 = vmul.f32 %v1880_v63, %v973_v59 }
 0x2ed   :  { %v978_v44 = vmul.f32 %v976_v42, %v913_v32  ;;  %v2873_v17 = vrot.slane %v976_v42, %v2426_v20  ;;  %v1122_v32 = vld [vmem:[#allocation6 + $0x18] sm:$0xff] }
 0x2ee   :  { %vm1147_vm13 = vcmp.ge.u32.totalorder %v1122_v32, 2147483648 }
 0x2ef   :  { %v979_v22 = vsub.f32 %v977_v35, %v978_v44  ;;  %v1010_v33 = vmul.f32 %v2873_v17, %v878_v37  ;;  %v986_v36 = vmul.f32 %v2873_v17, %v2721_v60  ;;  %v987_v26 = vmul.f32 %v2873_v17, %v2718_v57  ;;  %v1120_v60 = vld [vmem:[#allocation6 + $0x8] sm:$0xff]  ;;  %vm1560_vm3 = vmpackc.low %vm1147_vm13, %vm1146_vm12  ;;  %v1123_v44 = vld [vmem:[#allocation6 + $0x20] sm:$0xff] }
 0x2f0   :  { %v988_v28 = vmul.f32 %v2873_v17, %v2724_v62  ;;  %v989_v8 = vmul.f32 %v2873_v17, %v2736_v2  ;;  %vm1145_vm8 = vcmp.ge.u32.totalorder %v1120_v60, 2147483648  ;;  %v990_v3 = vmul.f32 %v2873_v17, %v2741_v11 }
 0x2f1   :  { %v2877_v38 = vrot.slane %v979_v22, %v2426_v20  ;;  %v991_v5 = vmul.f32 %v2873_v17, %v2750_v18  ;;  %vm1557_vm11 = vmpackc.low %vm1145_vm8, %vm1144_vm7  ;;  %v992_v11 = vmul.f32 %v2873_v17, %v2754_v23  ;;  %v993_v18 = vmul.f32 %v2873_v17, %v2763_v39 }
 0x2f2   :  { %v994_v22 = vmul.f32 %v2873_v17, %v2767_v16  ;;  %vm1148_vm4 = vcmp.ge.u32.totalorder %v1123_v44, 2147483648 }
 0x2f3   :  { %v2890_v34 = vadd.f32 %v2877_v38, %v1010_v33  ;;  %v1017_v20 = vadd.f32 %v2877_v38, %v986_v36  ;;  %v1018_v37 = vadd.f32 %v2877_v38, %v987_v26  ;;  %v1019_v48 = vadd.f32 %v2877_v38, %v988_v28  ;;  %v1124_v36 = vld [vmem:[#allocation6 + $0x28] sm:$0xff] }
 0x2f4   :  { %v1020_v57 = vadd.f32 %v2877_v38, %v989_v8  ;;  %v1021_v53 = vadd.f32 %v2877_v38, %v990_v3  ;;  %v1022_v15 = vadd.f32 %v2877_v38, %v991_v5  ;;  %v1023_v55 = vadd.f32 %v2877_v38, %v992_v11  ;;  %v2924_v8 = vld [vmem:[#allocation6 + $0x30] sm:$0xff]  ;;  %v1127_v11 = vld [vmem:[#allocation6 + $0x40] sm:$0xff] }
 0x2f5   :  { %v2898_v45 = vmul.f32 %v2883_v31, %v2890_v34  ;;  %vm1043_vm5 = vcmp.ge.f32.partialorder %v1017_v20, 0.0  ;;  %vm1044_vm6 = vcmp.ge.f32.partialorder %v1018_v37, 0.0  ;;  %v1069_v62 = vmul.f32 %v2883_v31, %v1017_v20 }
 0x2f6   :  { %v1070_v2 = vmul.f32 %v2883_v31, %v1018_v37  ;;  %v1071_v0 = vmul.f32 %v2883_v31, %v1019_v48  ;;  %v1072_v12 = vmul.f32 %v2883_v31, %v1020_v57  ;;  %vm1045_vm9 = vcmp.ge.f32.partialorder %v1019_v48, 0.0 }
 0x2f7   :  { %v1094_v4 = vsel %vm1043_vm5, %v1017_v20, %v1069_v62  ;;  %vm1046_vm10 = vcmp.ge.f32.partialorder %v1020_v57, 0.0  ;;  %v1024_v21 = vadd.f32 %v2877_v38, %v993_v18  ;;  %v1073_v23 = vmul.f32 %v2883_v31, %v1021_v53 }
 0x2f8   :  { %v1095_v47 = vsel %vm1044_vm6, %v1018_v37, %v1070_v2  ;;  %v1169_v49 = vmul.f32 2.0, %v1094_v4  ;;  %v1096_v43 = vsel %vm1045_vm9, %v1019_v48, %v1071_v0  ;;  %v1097_v41 = vsel %vm1046_vm10, %v1020_v57, %v1072_v12  ;;  %v1126_v48 = vld [vmem:[#allocation6 + $0x38] sm:$0xff] }
 0x2f9   :  { %v1170_v61 = vmul.f32 2.0, %v1095_v47  ;;  %v1074_v27 = vmul.f32 %v2883_v31, %v1022_v15  ;;  %v1171_v39 = vmul.f32 2.0, %v1096_v43  ;;  %v1172_v7 = vmul.f32 2.0, %v1097_v41 }
 0x2fa   :  { %vm1047_vm14 = vcmp.ge.f32.partialorder %v1021_v53, 0.0  ;;  %vm1048_vm15 = vcmp.ge.f32.partialorder %v1022_v15, 0.0  ;;  %v1075_v59 = vmul.f32 %v2883_v31, %v1023_v55  ;;  %v1076_v63 = vmul.f32 %v2883_v31, %v1024_v21 }
 0x2fb   :  { %v1558_v19 = vpack.c.bf16 %v1170_v61, %v1169_v49  ;;  %vm1049_vm1 = vcmp.ge.f32.partialorder %v1023_v55, 0.0  ;;  %vm1050_vm2 = vcmp.ge.f32.partialorder %v1024_v21, 0.0  ;;  %v1098_v42 = vsel %vm1047_vm14, %v1021_v53, %v1073_v23 }
 0x2fc   :  { %v1099_v35 = vsel %vm1048_vm15, %v1022_v15, %v1074_v27  ;;  %v1561_v33 = vpack.c.bf16 %v1172_v7, %v1171_v39  ;;  %v1100_v26 = vsel %vm1049_vm1, %v1023_v55, %v1075_v59  ;;  %v1101_v28 = vsel %vm1050_vm2, %v1024_v21, %v1076_v63 }
 0x2fd   :  { %1794 = vmatmul.mubr.msk.bf16.vlgmr.msra.gmra.mrb[28].mxu0 %vm1557_vm11, %v1558_v19  ;;  %v995_v20 = vmul.f32 %v2873_v17, %v2775_v46  ;;  %v1025_v37 = vadd.f32 %v2877_v38, %v994_v22  ;;  %v1173_v24 = vmul.f32 2.0, %v1098_v42  ;;  %v1174_v60 = vmul.f32 2.0, %v1099_v35 }
 0x2fe   :  { %1797 = vmatprep.mubr.msk.bf16.mxu0 %vm1975_vm0, %v1974_v1  ;;  %vm1149_vm5 = vcmp.ge.u32.totalorder %v1124_v36, 2147483648  ;;  %v996_v57 = vmul.f32 %v2873_v17, %v2779_v51  ;;  %v1002_v62 = vmul.f32 %v2873_v17, %v2815_v29  ;;  %vm1150_vm6 = vcmp.ge.u32.totalorder %v2924_v8, 2147483648 }
 0x2ff   :  { %v1026_v16 = vadd.f32 %v2877_v38, %v995_v20  ;;  %v2937_v46 = vmul.f32 2.0, %v1100_v26  ;;  %v2939_v2 = vmul.f32 2.0, %v1101_v28  ;;  %v997_v4 = vmul.f32 %v2873_v17, %v2787_v50  ;;  %vm1563_vm9 = vmpackc.low %vm1149_vm5, %vm1148_vm4 }
 0x300   :  { %v1003_v3 = vmul.f32 %v2873_v17, %v2823_v40  ;;  %vm1151_vm7 = vcmp.ge.u32.totalorder %v1126_v48, 2147483648  ;;  %v1077_v5 = vmul.f32 %v2883_v31, %v1025_v37  ;;  %v2947_v51 = vadd.f32 %v2877_v38, %v996_v57 }
 0x301   :  { %v1033_v29 = vadd.f32 %v2877_v38, %v1002_v62  ;;  %v1564_v47 = vpack.c.bf16 %v1174_v60, %v1173_v24  ;;  %vm1051_vm8 = vcmp.ge.f32.partialorder %v1025_v37, 0.0  ;;  %v2951_v49 = vadd.f32 %v2877_v38, %v997_v4 }
 0x302   :  { %v1034_v0 = vadd.f32 %v2877_v38, %v1003_v3  ;;  %v1078_v50 = vmul.f32 %v2883_v31, %v1026_v16  ;;  %v1004_v12 = vmul.f32 %v2873_v17, %v2827_v30  ;;  %v1567_v61 = vpack.c.bf16 %v2939_v2, %v2937_v46 }
 0x303   :  { %vm1059_vm10 = vcmp.ge.f32.partialorder %v1033_v29, 0.0  ;;  %v1085_v40 = vmul.f32 %v2883_v31, %v1033_v29  ;;  %vm1052_vm11 = vcmp.ge.f32.partialorder %v1026_v16, 0.0  ;;  %v1102_v15 = vsel %vm1051_vm8, %v1025_v37, %v1077_v5 }
 0x304   :  { %vm1060_vm12 = vcmp.ge.f32.partialorder %v1034_v0, 0.0  ;;  %v1086_v53 = vmul.f32 %v2883_v31, %v1034_v0  ;;  %v1005_v19 = vmul.f32 %v2873_v17, %v2835_v56  ;;  %v1035_v58 = vadd.f32 %v2877_v38, %v1004_v12  ;;  %v1129_v12 = vld [vmem:[#allocation6 + $0x50] sm:$0xff] }
 0x305   :  { %1798 = vmatmul.mubr.msk.bf16.gmra.mrb[32].mxu0 %vm1560_vm3, %v1561_v33  ;;  %v1110_v18 = vsel %vm1059_vm10, %v1033_v29, %v1085_v40  ;;  %v1006_v30 = vmul.f32 %v2873_v17, %v2839_v52  ;;  %v1007_v41 = vmul.f32 %v2873_v17, %v2847_v10  ;;  %v1103_v55 = vsel %vm1052_vm11, %v1026_v16, %v1078_v50  ;;  %vm1566_vm3 = vmpackc.low %vm1151_vm7, %vm1150_vm6  ;;  %v1128_v33 = vld [vmem:[#allocation6 + $0x48] sm:$0xff] }
 0x306   :  { %1801 = vmatprep.mubr.msk.bf16.mxu0 %vm1975_vm0, %v1974_v1  ;;  %v1111_v32 = vsel %vm1060_vm12, %v1034_v0, %v1086_v53  ;;  %v2966_v43 = vmul.f32 2.0, %v1110_v18  ;;  %v1036_v56 = vadd.f32 %v2877_v38, %v1005_v19  ;;  %vm1061_vm13 = vcmp.ge.f32.partialorder %v1035_v58, 0.0 }
 0x307   :  { %v2974_v21 = vmul.f32 2.0, %v1111_v32  ;;  %vm1152_vm14 = vcmp.ge.u32.totalorder %v1127_v11, 2147483648  ;;  %v1087_v23 = vmul.f32 %v2883_v31, %v1035_v58  ;;  %v1037_v27 = vadd.f32 %v2877_v38, %v1006_v30  ;;  %v1131_v30 = vld [vmem:[#allocation6 + $0x60] sm:$0xff] }
 0x308   :  { %v1038_v39 = vadd.f32 %v2877_v38, %v1007_v41  ;;  %v1008_v52 = vmul.f32 %v2873_v17, %v2853_v14  ;;  %vm1062_vm15 = vcmp.ge.f32.partialorder %v1036_v56, 0.0  ;;  %v1088_v7 = vmul.f32 %v2883_v31, %v1036_v56  ;;  %v1132_v41 = vld [vmem:[#allocation6 + $0x68] sm:$0xff] }
 0x309   :  { %v1582_v10 = vpack.c.bf16 %v2974_v21, %v2966_v43  ;;  %v1009_v59 = vmul.f32 %v2873_v17, %v2859_v25  ;;  %v1112_v63 = vsel %vm1061_vm13, %v1035_v58, %v1087_v23  ;;  %vm1063_vm1 = vcmp.ge.f32.partialorder %v1037_v27, 0.0  ;;  %v1141_v43 = vld [vmem:[#allocation6 + $0xb0] sm:$0xff]  ;;  %v1142_v21 = vld [vmem:[#allocation6 + $0xb8] sm:$0xff] }
 0x30a   :  { %vm1064_vm2 = vcmp.ge.f32.partialorder %v1038_v39, 0.0  ;;  %v1089_v42 = vmul.f32 %v2883_v31, %v1037_v27  ;;  %v1113_v35 = vsel %vm1062_vm15, %v1036_v56, %v1088_v7  ;;  %v2991_v14 = vmul.f32 2.0, %v1112_v63  ;;  %v1133_v7 = vld [vmem:[#allocation6 + $0x70] sm:$0xff] }
 0x30b   :  { %v1090_v44 = vmul.f32 %v2883_v31, %v1038_v39  ;;  %v1039_v22 = vadd.f32 %v2877_v38, %v1008_v52  ;;  %v2995_v36 = vmul.f32 2.0, %v1113_v35  ;;  %v1040_v26 = vadd.f32 %v2877_v38, %v1009_v59  ;;  %v1135_v35 = vld [vmem:[#allocation6 + $0x80] sm:$0xff] }
 0x30c   :  { %v1114_v25 = vsel %vm1063_vm1, %v1037_v27, %v1089_v42  ;;  %vm1067_vm4 = vcmp.ge.f32.partialorder %v2890_v34, 0.0  ;;  %vm1153_vm7 = vcmp.ge.u32.totalorder %v1128_v33, 2147483648  ;;  %v1177_v48 = vmul.f32 2.0, %v1102_v15  ;;  %v1139_v33 = vld [vmem:[#allocation6 + $0xa0] sm:$0xff] }
 0x30d   :  { %1802 = vmatmul.mubr.msk.bf16.gmra.mrb[36].mxu0 %vm1563_vm9, %v1564_v47  ;;  %v1115_v28 = vsel %vm1064_vm2, %v1038_v39, %v1090_v44  ;;  %v2999_v20 = vmul.f32 2.0, %v1114_v25  ;;  %vm1065_vm5 = vcmp.ge.f32.partialorder %v1039_v22, 0.0  ;;  %v1091_v8 = vmul.f32 %v2883_v31, %v1039_v22  ;;  %vm1569_vm10 = vmpackc.low %vm1153_vm7, %vm1152_vm14  ;;  %v1137_v44 = vld [vmem:[#allocation6 + $0x90] sm:$0xff]  ;;  %v1140_v25 = vld [vmem:[#allocation6 + $0xa8] sm:$0xff] }
 0x30e   :  { %1805 = vmatprep.mubr.msk.bf16.mxu0 %vm1975_vm0, %v1974_v1  ;;  %v1585_v37 = vpack.c.bf16 %v2995_v36, %v2991_v14  ;;  %v3004_v24 = vmul.f32 2.0, %v1115_v28  ;;  %vm1066_vm6 = vcmp.ge.f32.partialorder %v1040_v26, 0.0  ;;  %v1092_v60 = vmul.f32 %v2883_v31, %v1040_v26 }
 0x30f   :  { %v1116_v16 = vsel %vm1065_vm5, %v1039_v22, %v1091_v8  ;;  %v3011_v57 = vsel %vm1067_vm4, %v2890_v34, %v2898_v45  ;;  %v1178_v62 = vmul.f32 2.0, %v1103_v55  ;;  %v1079_v3 = vmul.f32 %v2883_v31, %v2947_v51  ;;  %v1138_v22 = vld [vmem:[#allocation6 + $0x98] sm:$0xff] }
 0x310   :  { %v1588_v46 = vpack.c.bf16 %v3004_v24, %v2999_v20  ;;  %v1117_v2 = vsel %vm1066_vm6, %v1040_v26, %v1092_v60  ;;  %v3015_v4 = vmul.f32 2.0, %v1116_v16  ;;  %v1080_v5 = vmul.f32 %v2883_v31, %v2951_v49  ;;  %v3078_v26 = vld [vmem:[%s3133_s13] ss:$0 sm:$0xff]  ;;  %s1976_s13 = smov [#allocation9]  }
 0x311   :  { %v3021_v29 = vmul.f32 2.0, %v1117_v2  ;;  %vm1053_vm8 = vcmp.ge.f32.partialorder %v2947_v51, 0.0  ;;  %vm1054_vm9 = vcmp.ge.f32.partialorder %v2951_v49, 0.0  ;;  %v998_v34 = vmul.f32 %v2873_v17, %v2791_v54  ;;  %s1469_s2 = sshll.u32 %s1976_s13, 4  ;;  %s1470_s2 = int_to_ptr.vmem [resolvable:$true] %s1469_s2 }
 0x312   :  { %v999_v45 = vmul.f32 %v2873_v17, %v2799_v6  ;;  %v1570_v0 = vpack.c.bf16 %v1178_v62, %v1177_v48  ;;  %v1104_v50 = vsel %vm1053_vm8, %v2947_v51, %v1079_v3  ;;  %v1105_v40 = vsel %vm1054_vm9, %v2951_v49, %v1080_v5  ;;  %s1937_s21 = scalar_lea.vmem %s1470_s2, 3200  ;;  %p1942_p8 = scmp.lt.s32.totalorder %s1470_s2, %s1470_s2 }
 0x313   :  { %v1591_v47 = vpack.c.bf16 %v3021_v29, %v3015_v4  ;;  %v1029_v53 = vadd.f32 %v2877_v38, %v998_v34  ;;  %vm1154_vm11 = vcmp.ge.u32.totalorder %v1129_v12, 2147483648  ;;  %v1179_v54 = vmul.f32 2.0, %v1104_v50  ;;  %p1938_p7 = scmp.ne.s32.totalorder %s1470_s2, %s1937_s21  ;;  %p1943_p9 = scmp.lt.s32.totalorder %s1937_s21, %s1937_s21 }
 0x314   :  { %v1030_v15 = vadd.f32 %v2877_v38, %v999_v45  ;;  %v1180_v6 = vmul.f32 2.0, %v1105_v40  ;;  %v1000_v49 = vmul.f32 %v2873_v17, %v2803_v13  ;;  %v1001_v18 = vmul.f32 %v2873_v17, %v2811_v9 }
 0x315   :  { %1806 = vmatmul.mubr.msk.bf16.gmra.mrb[40].mxu0 %vm1566_vm3, %v1567_v61  ;;  %v1130_v61 = vld [vmem:[#allocation6 + $0x58] sm:$0xff]  ;;  %v1081_v11 = vmul.f32 %v2883_v31, %v1029_v53  ;;  %vm1055_vm13 = vcmp.ge.f32.partialorder %v1029_v53, 0.0  ;;  %vm1156_vm1 = vcmp.ge.u32.totalorder %v1131_v30, 2147483648  ;;  %vm1157_vm2 = vcmp.ge.u32.totalorder %v1132_v41, 2147483648  ;;  %p1944_p10 = por %p1943_p9, %p1942_p8 }
 0x316   :  { %1809 = vmatprep.mubr.msk.bf16.mxu0 %vm1975_vm0, %v1974_v1  ;;  %vm1155_vm12 = vcmp.ge.u32.totalorder %v1130_v61, 2147483648  ;;  %v1082_v51 = vmul.f32 %v2883_v31, %v1030_v15  ;;  %vm1056_vm14 = vcmp.ge.f32.partialorder %v1030_v15, 0.0  ;;  %v1573_v19 = vpack.c.bf16 %v1180_v6, %v1179_v54  ;;  %vm1575_vm5 = vmpackc.low %vm1157_vm2, %vm1156_vm1 }
 0x317   :  { %vm1572_vm15 = vmpackc.low %vm1155_vm12, %vm1154_vm11  ;;  %v1106_v58 = vsel %vm1055_vm13, %v1029_v53, %v1081_v11  ;;  %v1031_v55 = vadd.f32 %v2877_v38, %v1000_v49  ;;  %v1032_v56 = vadd.f32 %v2877_v38, %v1001_v18  ;;  %v1134_v38 = vld [vmem:[#allocation6 + $0x78] sm:$0xff]  ;;  %vm1158_vm6 = vcmp.ge.u32.totalorder %v1133_v7, 2147483648  ;;  %p1945_p11 = pnand %p1944_p10, %p1938_p7 }
 0x318   :  { %v1107_v32 = vsel %vm1056_vm14, %v1030_v15, %v1082_v51  ;;  %v1181_v23 = vmul.f32 2.0, %v1106_v58  ;;  %vm1159_vm7 = vcmp.ge.u32.totalorder %v1134_v38, 2147483648  ;;  %vm1160_vm9 = vcmp.ge.u32.totalorder %v1135_v35, 2147483648 }
 0x319   :  { %v1182_v13 = vmul.f32 2.0, %v1107_v32  ;;  %v1083_v27 = vmul.f32 %v2883_v31, %v1031_v55  ;;  %v1084_v9 = vmul.f32 %v2883_v31, %v1032_v56  ;;  %vm1057_vm3 = vcmp.ge.f32.partialorder %v1031_v55, 0.0  ;;  %vm1578_vm8 = vmpackc.low %vm1159_vm7, %vm1158_vm6  ;;  %v1136_v31 = vld [vmem:[#allocation6 + $0x88] sm:$0xff] }
 0x31a   :  { %vm1058_vm4 = vcmp.ge.f32.partialorder %v1032_v56, 0.0  ;;  %vm1162_vm12 = vcmp.ge.u32.totalorder %v1137_v44, 2147483648  ;;  %vm1163_vm13 = vcmp.ge.u32.totalorder %v1138_v22, 2147483648  ;;  %vm1165_vm1 = vcmp.ge.u32.totalorder %v1140_v25, 2147483648 }
 0x31b   :  { %v1576_v17 = vpack.c.bf16 %v1182_v13, %v1181_v23  ;;  %v1108_v39 = vsel %vm1057_vm3, %v1031_v55, %v1083_v27  ;;  %v1109_v52 = vsel %vm1058_vm4, %v1032_v56, %v1084_v9  ;;  %vm1584_vm14 = vmpackc.low %vm1163_vm13, %vm1162_vm12  ;;  %vm1166_vm3 = vcmp.ge.u32.totalorder %v1141_v43, 2147483648 }
 0x31c   :  { %v1183_v59 = vmul.f32 2.0, %v1108_v39  ;;  %v1184_v63 = vmul.f32 2.0, %v1109_v52  ;;  %vm1167_vm4 = vcmp.ge.u32.totalorder %v1142_v21, 2147483648  ;;  %v1193_v14 = vmul.f32 2.0, %v3011_v57 }
 0x31d   :  { %1810 = vmatmul.mubr.msk.bf16.gmra.mrb[44].mxu0 %vm1569_vm10, %v1570_v0  ;;  %vm1161_vm10 = vcmp.ge.u32.totalorder %v1136_v31, 2147483648 }
 0x31e   :  { %1813 = vmatprep.mubr.msk.bf16.mxu0 %vm1975_vm0, %v1974_v1  ;;  %v1579_v42 = vpack.c.bf16 %v1184_v63, %v1183_v59  ;;  %vm1581_vm11 = vmpackc.low %vm1161_vm10, %vm1160_vm9  ;;  %v1594_v36 = vpack.c.bf16 %v1193_v14, %v1193_v14 }
 0x325   :  { %1814 = vmatmul.mubr.msk.bf16.gmra.mrb[48].mxu0 %vm1572_vm15, %v1573_v19  ;;  %vm1164_vm15 = vcmp.ge.u32.totalorder %v1139_v33, 2147483648 }
 0x326   :  { %1817 = vmatprep.mubr.msk.bf16.mxu0 %vm1975_vm0, %v1974_v1  ;;  %vm1587_vm2 = vmpackc.low %vm1165_vm1, %vm1164_vm15 }
 0x32d   :  { %1818 = vmatmul.mubr.msk.bf16.gmra.mrb[52].mxu0 %vm1575_vm5, %v1576_v17  ;;  %vm1590_vm5 = vmpackc.low %vm1167_vm4, %vm1166_vm3 }
 0x32e   :  { %1821 = vmatprep.mubr.msk.bf16.mxu0 %vm1975_vm0, %v1974_v1 }
 0x335   :  { %1822 = vmatmul.mubr.msk.bf16.gmra.mrb[56].mxu0 %vm1578_vm8, %v1579_v42 }
 0x336   :  { %1825 = vmatprep.mubr.msk.bf16.mxu0 %vm1975_vm0, %v1974_v1 }
 0x33d   :  { %1826 = vmatmul.mubr.msk.bf16.gmra.mrb[60].mxu0 %vm1581_vm11, %v1582_v10  ;;  %v1143_v10 = vld [vmem:[#allocation6 + $0xc0] sm:$0xff] }
 0x33e   :  { %1829 = vmatprep.mubr.msk.bf16.mxu0 %vm1975_vm0, %v1974_v1  ;;  %vm1168_vm6 = vcmp.ge.u32.totalorder %v1143_v10, 2147483648 }
 0x33f   :  { %vm1593_vm7 = vmpackc.low %vm1168_vm6, %vm1168_vm6 }
 0x345   :  { %1830 = vmatmul.mubr.msk.bf16.gmra.mrb[64].mxu0 %vm1584_vm14, %v1585_v37 }
 0x346   :  { %1833 = vmatprep.mubr.msk.bf16.mxu0 %vm1975_vm0, %v1974_v1 }
 0x34d   :  { %1834 = vmatmul.mubr.msk.bf16.gmra.mrb[68].mxu0 %vm1587_vm2, %v1588_v46 }
 0x34e   :  { %1837 = vmatprep.mubr.msk.bf16.mxu0 %vm1975_vm0, %v1974_v1 }
 0x355   :  { %1838 = vmatmul.mubr.msk.bf16.gmra.mrb[72].mxu0 %vm1590_vm5, %v1591_v47 }
 0x356   :  { %1841 = vmatprep.mubr.msk.bf16.mxu0 %vm1975_vm0, %v1974_v1 }
 0x35d   :  { %1842 = vmatmul.mubr.msk.bf16.gmra.mrb[76].mxu0 %vm1593_vm7, %v1594_v36 }
 0x3d0   :  { %v1337_v28 = vpop.f32.mrb[28].mxu0 }
 0x3d1   :  { %v1338_v20 = vadd.f32 %v3078_v26, %v1337_v28  ;;  %v1795_v8 = vpop.f32.mrb[29].mxu0 }
 0x3d2   :  { %v1340_v37 = vpop.f32.mrb[30].mxu0 }
 0x3d3   :  { %1439 = vst [vmem:[#allocation9] sm:$0xff] %v1338_v20  ;;  %v1341_v24 = vadd.f32 %v3078_v26, %v1340_v37  ;;  %v1796_v1 = vpop.f32.mrb[31].mxu0 }
 0x3d5   :  { %1440 = vst [vmem:[#allocation9 + $0x8] sm:$0xff] %v1341_v24 }
 0x3d8   :  { %v1345_v60 = vpop.f32.mrb[32].mxu0 }
 0x3d9   :  { %v1346_v48 = vadd.f32 %v3078_v26, %v1345_v60  ;;  %v1799_v16 = vpop.f32.mrb[33].mxu0 }
 0x3da   :  { %v1348_v57 = vpop.f32.mrb[34].mxu0 }
 0x3db   :  { %1441 = vst [vmem:[#allocation9 + $0x10] sm:$0xff] %v1346_v48  ;;  %v1349_v62 = vadd.f32 %v3078_v26, %v1348_v57  ;;  %v1800_v46 = vpop.f32.mrb[35].mxu0 }
 0x3dd   :  { %1442 = vst [vmem:[#allocation9 + $0x18] sm:$0xff] %v1349_v62 }
 0x3e0   :  { %v1353_v2 = vpop.f32.mrb[36].mxu0 }
 0x3e1   :  { %v1354_v4 = vadd.f32 %v3078_v26, %v1353_v2  ;;  %v1803_v3 = vpop.f32.mrb[37].mxu0 }
 0x3e2   :  { %v1356_v5 = vpop.f32.mrb[38].mxu0 }
 0x3e3   :  { %1443 = vst [vmem:[#allocation9 + $0x20] sm:$0xff] %v1354_v4  ;;  %v1357_v29 = vadd.f32 %v3078_v26, %v1356_v5  ;;  %v1804_v34 = vpop.f32.mrb[39].mxu0 }
 0x3e5   :  { %1444 = vst [vmem:[#allocation9 + $0x28] sm:$0xff] %v1357_v29 }
 0x3e8   :  { %v1361_v45 = vpop.f32.mrb[40].mxu0 }
 0x3e9   :  { %v1362_v47 = vadd.f32 %v3078_v26, %v1361_v45  ;;  %v1807_v0 = vpop.f32.mrb[41].mxu0 }
 0x3ea   :  { %v1364_v50 = vpop.f32.mrb[42].mxu0 }
 0x3eb   :  { %1445 = vst [vmem:[#allocation9 + $0x30] sm:$0xff] %v1362_v47  ;;  %v1365_v40 = vadd.f32 %v3078_v26, %v1364_v50  ;;  %v1808_v12 = vpop.f32.mrb[43].mxu0 }
 0x3ed   :  { %1446 = vst [vmem:[#allocation9 + $0x38] sm:$0xff] %v1365_v40 }
 0x3f0   :  { %v1369_v61 = vpop.f32.mrb[44].mxu0 }
 0x3f1   :  { %v1370_v53 = vadd.f32 %v3078_v26, %v1369_v61  ;;  %v1811_v15 = vpop.f32.mrb[45].mxu0 }
 0x3f2   :  { %v1372_v54 = vpop.f32.mrb[46].mxu0 }
 0x3f3   :  { %1447 = vst [vmem:[#allocation9 + $0x40] sm:$0xff] %v1370_v53  ;;  %v1373_v6 = vadd.f32 %v3078_v26, %v1372_v54  ;;  %v1812_v11 = vpop.f32.mrb[47].mxu0 }
 0x3f5   :  { %1448 = vst [vmem:[#allocation9 + $0x48] sm:$0xff] %v1373_v6 }
 0x3f8   :  { %v1377_v51 = vpop.f32.mrb[48].mxu0 }
 0x3f9   :  { %v1378_v49 = vadd.f32 %v3078_v26, %v1377_v51  ;;  %v1815_v18 = vpop.f32.mrb[49].mxu0 }
 0x3fa   :  { %v1380_v19 = vpop.f32.mrb[50].mxu0 }
 0x3fb   :  { %1449 = vst [vmem:[#allocation9 + $0x50] sm:$0xff] %v1378_v49  ;;  %v1381_v58 = vadd.f32 %v3078_v26, %v1380_v19  ;;  %v1816_v32 = vpop.f32.mrb[51].mxu0 }
 0x3fd   :  { %1450 = vst [vmem:[#allocation9 + $0x58] sm:$0xff] %v1381_v58 }
 0x400   :  { %v1385_v30 = vpop.f32.mrb[52].mxu0 }
 0x401   :  { %v1386_v41 = vadd.f32 %v3078_v26, %v1385_v30  ;;  %v1819_v55 = vpop.f32.mrb[53].mxu0 }
 0x402   :  { %v1388_v56 = vpop.f32.mrb[54].mxu0 }
 0x403   :  { %1451 = vst [vmem:[#allocation9 + $0x60] sm:$0xff] %v1386_v41  ;;  %v1389_v23 = vadd.f32 %v3078_v26, %v1388_v56  ;;  %v1820_v13 = vpop.f32.mrb[55].mxu0 }
 0x405   :  { %1452 = vst [vmem:[#allocation9 + $0x68] sm:$0xff] %v1389_v23 }
 0x408   :  { %v1393_v27 = vpop.f32.mrb[56].mxu0 }
 0x409   :  { %v1394_v9 = vadd.f32 %v3078_v26, %v1393_v27  ;;  %v1823_v17 = vpop.f32.mrb[57].mxu0 }
 0x40a   :  { %v1396_v39 = vpop.f32.mrb[58].mxu0 }
 0x40b   :  { %1453 = vst [vmem:[#allocation9 + $0x70] sm:$0xff] %v1394_v9  ;;  %v1397_v52 = vadd.f32 %v3078_v26, %v1396_v39  ;;  %v1824_v7 = vpop.f32.mrb[59].mxu0 }
 0x40d   :  { %1454 = vst [vmem:[#allocation9 + $0x78] sm:$0xff] %v1397_v52 }
 0x410   :  { %v1401_v38 = vpop.f32.mrb[60].mxu0 }
 0x411   :  { %v1402_v59 = vadd.f32 %v3078_v26, %v1401_v38  ;;  %v1827_v63 = vpop.f32.mrb[61].mxu0 }
 0x412   :  { %v1404_v42 = vpop.f32.mrb[62].mxu0 }
 0x413   :  { %1455 = vst [vmem:[#allocation9 + $0x80] sm:$0xff] %v1402_v59  ;;  %v1405_v35 = vadd.f32 %v3078_v26, %v1404_v42  ;;  %v1828_v31 = vpop.f32.mrb[63].mxu0 }
 0x415   :  { %1456 = vst [vmem:[#allocation9 + $0x88] sm:$0xff] %v1405_v35 }
 0x418   :  { %v1409_v44 = vpop.f32.mrb[64].mxu0 }
 0x419   :  { %v1410_v22 = vadd.f32 %v3078_v26, %v1409_v44  ;;  %v1831_v33 = vpop.f32.mrb[65].mxu0 }
 0x41a   :  { %v1412_v25 = vpop.f32.mrb[66].mxu0 }
 0x41b   :  { %1457 = vst [vmem:[#allocation9 + $0x90] sm:$0xff] %v1410_v22  ;;  %v1413_v43 = vadd.f32 %v3078_v26, %v1412_v25  ;;  %v1832_v21 = vpop.f32.mrb[67].mxu0 }
 0x41d   :  { %1458 = vst [vmem:[#allocation9 + $0x98] sm:$0xff] %v1413_v43 }
 0x420   :  { %v1417_v10 = vpop.f32.mrb[68].mxu0 }
 0x421   :  { %v1418_v14 = vadd.f32 %v3078_v26, %v1417_v10  ;;  %v1835_v36 = vpop.f32.mrb[69].mxu0 }
 0x422   :  { %v1420_v28 = vpop.f32.mrb[70].mxu0 }
 0x423   :  { %1459 = vst [vmem:[#allocation9 + $0xa0] sm:$0xff] %v1418_v14  ;;  %v1421_v20 = vadd.f32 %v3078_v26, %v1420_v28  ;;  %v1836_v8 = vpop.f32.mrb[71].mxu0 }
 0x425   :  { %1460 = vst [vmem:[#allocation9 + $0xa8] sm:$0xff] %v1421_v20 }
 0x428   :  { %v1425_v37 = vpop.f32.mrb[72].mxu0 }
 0x429   :  { %v1426_v24 = vadd.f32 %v3078_v26, %v1425_v37  ;;  %v1839_v1 = vpop.f32.mrb[73].mxu0 }
 0x42a   :  { %v1428_v60 = vpop.f32.mrb[74].mxu0 }
 0x42b   :  { %1461 = vst [vmem:[#allocation9 + $0xb0] sm:$0xff] %v1426_v24  ;;  %v1429_v48 = vadd.f32 %v3078_v26, %v1428_v60  ;;  %v1840_v16 = vpop.f32.mrb[75].mxu0 }
 0x42d   :  { %1462 = vst [vmem:[#allocation9 + $0xb8] sm:$0xff] %v1429_v48 }
 0x430   :  { %v1433_v57 = vpop.f32.mrb[76].mxu0 }
 0x431   :  { %v1434_v62 = vadd.f32 %v3078_v26, %v1433_v57  ;;  %v1843_v46 = vpop.f32.mrb[77].mxu0 }
 0x432   :  { %v1436_v2 = vpop.f32.mrb[78].mxu0 }
 0x433   :  { %1463 = vst [vmem:[#allocation9 + $0xc0] sm:$0xff] %v1434_v62  ;;  %v1844_v4 = vpop.f32.mrb[79].mxu0 }
 0x434   :  { %1948 = shalt.err (!%p1945_p11)
}
 0x435   :  { %s1949_s24 = scalar_lea.hbm %s3134_s14, 3200 }
 0x436   :  { %p1950_p12 = scmp.ne.s32.totalorder %s3134_s14, %s1949_s24  ;;  %p1953_p13 = scmp.lt.u32.totalorder %s1949_s24, %s3134_s14 }
 0x438   :  { %p1955_p0 = pnand %p1953_p13, %p1950_p12 }
 0x43a   :  { %1958 = shalt.err (!%p1955_p0)
}
 0x43b   :  { %1475 = dma.vmem_to_hbm [thread:$0]  %s1470_s2, 3200, %s3134_s14, [#allocation4], %s1969_s27, %s1969_s27, %s1970_s28  }
 0x43c   :  { %1965 = dma.done.wait [#allocation4], 3200  }
 0x43d   :  { %1966 = vsyncadd [#allocation4], 4294964096 }
 0x43e   :  { %1479 = vsyncpa [#allocation3], 1 }
 0x43f   :  { %1480 = vsyncpa [#allocation8], 1 }
 0x440   :  { %1481 = vsyncpa [#allocation4], 1 }
 0x441   :  { %1482 = vsyncpa [#allocation5], 1 }

</bundles_post_ra>
